<compile_context>
chip_gen: v7x
topology: tpu7x:2x2x1
jax: 0.10.0
libtpu: 0.0.40
codegen_flags: <defaults>
</compile_context>

<pallas_src>
import functools

import jax
import jax.numpy as jnp
from jax.experimental import pallas as pl
from jax.experimental.pallas import tpu as pltpu

EPS = 1e-6


def _elu_p1(x):
    # elu(x) + 1 == where(x > 0, x + 1, exp(x)); clamp exp arg so the
    # unselected branch never produces inf.
    x = x.astype(jnp.float32)
    return jnp.where(x > 0, x + 1.0, jnp.exp(jnp.minimum(x, 0.0)))


def _causal_linear_kernel(lens_ref, q_ref, k_ref, v_ref, o_ref, kv_state,
                          *opt_scratch, matmul_dtype, fold_denom):
    """One (batch, head-group, seq-chunk) tile; inputs in native (L, H, E) layout.

    Carried VMEM state across the innermost (sequential, 'arbitrary') chunk axis:
      kv_state:   (Hb, E, D+1) running K^T [V|1]   (fold_denom == True)
                  (Hb, E, D)   running K^T V       (fold_denom == False)
      ksum_state: (1, Hb, E)   running sum of K    (fold_denom == False only)
    The carry is only correct because the chunk axis is the innermost grid axis
    marked 'arbitrary' (runs in order on one core) and is reset at c == 0.
    Do not reorder grid axes or mark the chunk axis 'parallel'.
    """
    n = pl.program_id(0)
    c = pl.program_id(2)
    mm = matmul_dtype
    ksum_state = opt_scratch[0] if opt_scratch else None

    @pl.when(c == 0)
    def _():
        kv_state[...] = jnp.zeros_like(kv_state)
        if ksum_state is not None:
            ksum_state[...] = jnp.zeros_like(ksum_state)

    C, Hb, E = q_ref.shape[1], q_ref.shape[2], q_ref.shape[3]
    D = v_ref.shape[3]

    # Feature map + key-length masking (elementwise, native (C, Hb, E) layout).
    # The length mask is rebuilt from an SMEM scalar (no mask DMA stream).
    q = _elu_p1(q_ref[0])                                        # (C, Hb, E) f32
    pos = c * C + jax.lax.broadcasted_iota(jnp.int32, (C, 1, 1), 0)
    kmask = (pos < lens_ref[n]).astype(jnp.float32)              # (C, 1, 1)
    k = _elu_p1(k_ref[0]) * kmask                                # (C, Hb, E) f32
    v = v_ref[0].astype(jnp.float32)                             # (C, Hb, D) f32

    # Head-major relayout on the VMEM tile (cheap XLU work vs. the HBM
    # transpose passes it replaces), done in the matmul dtype so bf16 moves
    # half the bytes.
    qh = pltpu.einshape('lhe->hle', q.astype(mm))                # (Hb, C, E)
    kh = pltpu.einshape('lhe->hle', k.astype(mm))                # (Hb, C, E)
    vh = pltpu.einshape('lhd->hld', v.astype(mm))                # (Hb, C, D)

    # Intra-chunk causal scores (batched over heads).
    qk = jnp.einsum('hce,hke->hck', qh, kh,
                    preferred_element_type=jnp.float32)          # (Hb, C, C) f32
    row = jax.lax.broadcasted_iota(jnp.int32, (C, C), 0)
    col = jax.lax.broadcasted_iota(jnp.int32, (C, C), 1)
    qk = jnp.where((row >= col)[None], qk, 0.0)
    qk_mm = qk.astype(mm)

    kv = kv_state[...]                                           # single load (f32)

    if fold_denom:
        # Ones column folded into V: numerator and denominator fall out of the
        # same MXU matmuls (free, since the N dim pads to 128 anyway).
        v1 = jnp.concatenate([vh, jnp.ones((Hb, C, 1), mm)], -1)     # (Hb, C, D+1)
        num = (jnp.einsum('hck,hkd->hcd', qk_mm, v1,
                          preferred_element_type=jnp.float32)
               + jnp.einsum('hce,hed->hcd', qh, kv.astype(mm),
                            preferred_element_type=jnp.float32))     # (Hb, C, D+1)
        z = num[..., D:] + EPS                                       # (Hb, C, 1)
        out = num[..., :D]                                           # (Hb, C, D)
        kv_state[...] = kv + jnp.einsum('hce,hcd->hed', kh, v1,
                                        preferred_element_type=jnp.float32)
    else:
        # D is a multiple of 128: keep the matmuls at N == D and carry a
        # separate running k-sum for the denominator (VPU mul + XLU reduce).
        ks = ksum_state[...]                                         # (1, Hb, E) f32
        num = (jnp.einsum('hck,hkd->hcd', qk_mm, vh,
                          preferred_element_type=jnp.float32)
               + jnp.einsum('hce,hed->hcd', qh, kv.astype(mm),
                            preferred_element_type=jnp.float32))     # (Hb, C, D)
        z_intra = jnp.sum(qk, axis=-1, keepdims=True)                # (Hb, C, 1)
        z_prev = pltpu.einshape(
            'lhx->hlx', jnp.sum(q * ks, axis=-1, keepdims=True))     # (Hb, C, 1)
        z = z_intra + z_prev + EPS
        out = num
        kv_state[...] = kv + jnp.einsum('hce,hcd->hed', kh, vh,
                                        preferred_element_type=jnp.float32)
        ksum_state[...] = ks + jnp.sum(k, axis=0, keepdims=True)     # exact f32

    if matmul_dtype == jnp.float32:
        inv_z = 1.0 / z
    else:
        # EUP slot, ~free; adds ~2^-12 rel. error on top of the bf16 path.
        inv_z = pl.reciprocal(z, approx=True)
    out = out * inv_z                                                # (Hb, C, D) f32

    # Lane-dense store of the head-group slab.
    od = o_ref.dtype
    if D % 128 == 0:
        # Per-head stores are lane-aligned and unmasked.
        for h in range(Hb):
            o_ref[0, :, h * D:(h + 1) * D] = out[h].astype(od)
    else:
        o_ref[0] = jnp.concatenate([out[h] for h in range(Hb)],
                                   axis=-1).astype(od)


def causal_linear_attention(queries, keys, values, key_lengths, *,
                            lower_triangular=True, chunk=128,
                            matmul_dtype=jnp.bfloat16):
    """Forward pass of CausalLinearAttention.

    queries: (N, L, H, E)  keys: (N, S, H, E)  values: (N, S, H, D)
    key_lengths: (N,) int lengths (== key_lengths.lengths; the {0,1} float
                 matrix of the PyTorch LengthMask is rebuilt in-kernel).
    returns: (N, L, H, D) in queries.dtype.
    Pass bf16 queries/keys/values to halve the kernel's HBM read traffic.
    """
    if not lower_triangular:
        raise RuntimeError(
            "CausalLinearAttention only supports full lower triangular masks")

    N, L, H, E = queries.shape
    _, S, _, D = values.shape
    assert keys.shape == (N, S, H, E)
    # TODO(synk): implement _make_sizes_compatible (pad/slice K) for L != S.
    assert L == S, "this kernel assumes L == S"

    # Chunk: sublane-aligned, capped at 128 (matches the v5e MXU depth; on
    # v6e/v7x utilization comes from batching heads, not a larger chunk).
    chunk = int(min(chunk, -(-L // 8) * 8))
    chunk = max(8, chunk - chunk % 8)

    fold_denom = (D % 128 != 0)

    # Head grouping: process all H heads per grid step.  Only split into G > 1
    # groups when the batch alone cannot feed both v7x TensorCores AND the
    # split keeps the BlockSpec dims legal (Hb % 8 == 0, Hb*D % 128 == 0).
    G = 1
    if N == 1:
        for cand in (2, 4, 8):
            if H % cand:
                continue
            hb = H // cand
            if hb % 8 == 0 and (hb * D) % 128 == 0:
                G = cand
                break
    Hb = H // G

    in_bytes = jnp.dtype(queries.dtype).itemsize
    out_bytes = in_bytes
    mm_bytes = jnp.dtype(matmul_dtype).itemsize

    def rup(x, m):
        return -(-x // m) * m

    def vmem_bytes(ck):
        dp = D + 1 if fold_denom else D
        face_qk = rup(Hb, 8) * rup(E, 128)
        face_v = rup(Hb, 8) * rup(D, 128)
        bufs = 2 * ck * (2 * face_qk + face_v) * in_bytes            # dbl-buffered in
        bufs += 2 * rup(ck, 8) * rup(Hb * D, 128) * out_bytes        # dbl-buffered out
        scores = Hb * rup(ck, 8) * rup(ck, 128) * (4 + mm_bytes)     # qk f32 + mm copy
        states = Hb * rup(E, 8) * rup(dp, 128) * 4 + 8 * rup(Hb * E, 128) * 4
        temps = ck * Hb * (2 * E + D) * (4 + mm_bytes)               # f32 + head-major
        temps += 2 * Hb * rup(ck, 8) * rup(dp, 128) * 4              # num / out f32
        return bufs + scores + states + temps

    VMEM_BUDGET = 22 * 1024 * 1024      # headroom inside the 32 MiB limit below
    while chunk > 8 and vmem_bytes(chunk) > VMEM_BUDGET:
        chunk = max(8, (chunk // 2) - (chunk // 2) % 8)

    Lp = -(-L // chunk) * chunk

    # Native-layout inputs: no wrapper transposes.  Only pad the sequence dim
    # when needed (padded key rows are zeroed by the in-kernel length mask;
    # padded query rows produce garbage that is sliced off below -- keep the
    # final [:, :L]).
    q, k, v = queries, keys, values
    if Lp != L:
        pad = ((0, 0), (0, Lp - L), (0, 0), (0, 0))
        q = jnp.pad(q, pad)
        k = jnp.pad(k, pad)
        v = jnp.pad(v, pad)

    lens = jnp.asarray(key_lengths, dtype=jnp.int32).reshape(N)

    kernel = functools.partial(_causal_linear_kernel,
                               matmul_dtype=matmul_dtype,
                               fold_denom=fold_denom)

    Dp = D + 1 if fold_denom else D
    scratch = [pltpu.VMEM((Hb, E, Dp), jnp.float32)]      # running K^T [V|1] / K^T V
    if not fold_denom:
        scratch.append(pltpu.VMEM((1, Hb, E), jnp.float32))   # running sum of K

    out = pl.pallas_call(
        kernel,
        out_shape=jax.ShapeDtypeStruct((N, Lp, H * D), queries.dtype),
        grid_spec=pltpu.PrefetchScalarGridSpec(
            num_scalar_prefetch=1,               # per-batch key lengths -> SMEM
            grid=(N, G, Lp // chunk),            # chunk axis innermost (carry!)
            in_specs=[
                pl.BlockSpec((1, chunk, Hb, E), lambda n, g, c, ln: (n, c, g, 0)),
                pl.BlockSpec((1, chunk, Hb, E), lambda n, g, c, ln: (n, c, g, 0)),
                pl.BlockSpec((1, chunk, Hb, D), lambda n, g, c, ln: (n, c, g, 0)),
            ],
            out_specs=pl.BlockSpec((1, chunk, Hb * D),
                                   lambda n, g, c, ln: (n, c, g)),
            scratch_shapes=scratch,
        ),
        compiler_params=pltpu.CompilerParams(
            dimension_semantics=("parallel", "parallel", "arbitrary"),
            vmem_limit_bytes=32 * 1024 * 1024),
    )(lens, q, k, v)

    # (N, Lp, H*D) -> (N, L, H, D): the reshape only splits trailing dims
    # (free); the slice drops the padded garbage rows.
    out = out.reshape(N, Lp, H, D)
    return out[:, :L]


def _reference(queries, keys, values, key_lengths_mask, eps=1e-6):
    """Plain-JAX reference matching the PyTorch module semantics."""
    Q = _elu_p1(queries)
    K = _elu_p1(keys) * key_lengths_mask[:, :, None, None]
    Kcum = jnp.cumsum(K, axis=1)
    Z = 1.0 / (jnp.einsum('nlhi,nlhi->nlh', Q, Kcum) + eps)
    L = Q.shape[1]
    qk = jnp.einsum('nlhe,nshe->nhls', Q, K)
    mask = jnp.tril(jnp.ones((L, L), dtype=bool))
    qk = jnp.where(mask[None, None], qk, 0.0)
    Vn = jnp.einsum('nhls,nshd->nlhd', qk, values.astype(jnp.float32))
    return Vn * Z[..., None]


def _mask_from_lens(L, lens):
    return (jnp.arange(L)[None, :] < lens[:, None]).astype(jnp.float32)


if __name__ == "__main__":
    N, L, H, E, D = 2, 16, 4, 32, 32
    k1, k2, k3 = jax.random.split(jax.random.PRNGKey(0), 3)
    queries = jax.random.normal(k1, (N, L, H, E), jnp.float32)
    keys = jax.random.normal(k2, (N, L, H, E), jnp.float32)
    values = jax.random.normal(k3, (N, L, H, D), jnp.float32)
    lengths = jnp.array([16, 12], dtype=jnp.int32)
    ref = _reference(queries, keys, values, _mask_from_lens(L, lengths))

    # 1) Exact-math (f32 MXU) path, single chunk.
    out_f32 = causal_linear_attention(queries, keys, values, lengths,
                                      matmul_dtype=jnp.float32)
    # 2) Exact-math path, multiple chunks (exercises the kv_state carry).
    out_chunked = causal_linear_attention(queries, keys, values, lengths,
                                          chunk=8, matmul_dtype=jnp.float32)
    # 3) Default fast path: bf16 MXU operands, f32 accumulation + carry.
    out_bf16 = causal_linear_attention(queries, keys, values, lengths)
    # 4) bf16 activations in (halves HBM read traffic), default fast path.
    out_bf16in = causal_linear_attention(queries.astype(jnp.bfloat16),
                                         keys.astype(jnp.bfloat16),
                                         values.astype(jnp.bfloat16), lengths)
    jax.block_until_ready((out_f32, out_chunked, out_bf16, out_bf16in))

    assert out_f32.shape == (N, L, H, D)
    assert jnp.allclose(out_f32, ref, atol=1e-3, rtol=1e-3), float(
        jnp.max(jnp.abs(out_f32 - ref)))
    assert jnp.allclose(out_chunked, ref, atol=1e-3, rtol=1e-3), float(
        jnp.max(jnp.abs(out_chunked - ref)))
    assert jnp.allclose(out_bf16, ref, atol=1e-1, rtol=1e-1), float(
        jnp.max(jnp.abs(out_bf16 - ref)))
    assert jnp.allclose(out_bf16in.astype(jnp.float32), ref,
                        atol=1.5e-1, rtol=1.5e-1), float(
        jnp.max(jnp.abs(out_bf16in.astype(jnp.float32) - ref)))

    # 5) Sequence padding (L not a multiple of 8) + short key length.
    N2, L2, H2, E2, D2 = 1, 12, 2, 16, 16
    j1, j2, j3 = jax.random.split(jax.random.PRNGKey(1), 3)
    q2 = jax.random.normal(j1, (N2, L2, H2, E2), jnp.float32)
    k2_ = jax.random.normal(j2, (N2, L2, H2, E2), jnp.float32)
    v2 = jax.random.normal(j3, (N2, L2, H2, D2), jnp.float32)
    len2 = jnp.array([9], dtype=jnp.int32)
    out2 = causal_linear_attention(q2, k2_, v2, len2, matmul_dtype=jnp.float32)
    ref2 = _reference(q2, k2_, v2, _mask_from_lens(L2, len2))
    out2 = jax.block_until_ready(out2)
    assert jnp.allclose(out2, ref2, atol=1e-3, rtol=1e-3), float(
        jnp.max(jnp.abs(out2 - ref2)))

    # 6) D % 128 == 0 path (separate running k-sum, no ones-column fold),
    #    multiple chunks.
    N3, L3, H3, E3, D3 = 1, 16, 1, 16, 128
    m1, m2, m3 = jax.random.split(jax.random.PRNGKey(2), 3)
    q3 = jax.random.normal(m1, (N3, L3, H3, E3), jnp.float32)
    k3_ = jax.random.normal(m2, (N3, L3, H3, E3), jnp.float32)
    v3 = jax.random.normal(m3, (N3, L3, H3, D3), jnp.float32)
    len3 = jnp.array([11], dtype=jnp.int32)
    out3 = causal_linear_attention(q3, k3_, v3, len3, chunk=8,
                                   matmul_dtype=jnp.float32)
    ref3 = _reference(q3, k3_, v3, _mask_from_lens(L3, len3))
    out3 = jax.block_until_ready(out3)
    assert jnp.allclose(out3, ref3, atol=1e-3, rtol=1e-3), float(
        jnp.max(jnp.abs(out3 - ref3)))

    # 7) Single-batch head-group split (N == 1, G == 2: both v7x cores fed).
    N4, L4, H4, E4, D4 = 1, 8, 16, 8, 16
    p1, p2, p3 = jax.random.split(jax.random.PRNGKey(3), 3)
    q4 = jax.random.normal(p1, (N4, L4, H4, E4), jnp.float32)
    k4_ = jax.random.normal(p2, (N4, L4, H4, E4), jnp.float32)
    v4 = jax.random.normal(p3, (N4, L4, H4, D4), jnp.float32)
    len4 = jnp.array([5], dtype=jnp.int32)
    out4 = causal_linear_attention(q4, k4_, v4, len4, matmul_dtype=jnp.float32)
    ref4 = _reference(q4, k4_, v4, _mask_from_lens(L4, len4))
    out4 = jax.block_until_ready(out4)
    assert jnp.allclose(out4, ref4, atol=1e-3, rtol=1e-3), float(
        jnp.max(jnp.abs(out4 - ref4)))

    print("KERNEL_OK")
</pallas_src>

<mosaic_0001>
module attributes {stable_mosaic.version = 11 : i64} {
  func.func @_causal_linear_kernel(%arg0: i32, %arg1: i32, %arg2: i32, %arg3: memref<2xi32, #tpu.memory_space<smem>>, %arg4: memref<1x16x4x32xf32, #tpu.memory_space<vmem>>, %arg5: memref<1x16x4x32xf32, #tpu.memory_space<vmem>>, %arg6: memref<1x16x4x32xf32, #tpu.memory_space<vmem>>, %arg7: memref<1x16x128xf32, #tpu.memory_space<vmem>>, %arg8: memref<4x32x33xf32, #tpu.memory_space<vmem>>) attributes {dimension_semantics = [#tpu.dimension_semantics<parallel>, #tpu.dimension_semantics<parallel>, #tpu.dimension_semantics<arbitrary>], iteration_bounds = array<i64: 2, 1, 1>, scalar_prefetch = 1 : i64, scratch_operands = 1 : i64, tpu.core_type = #tpu.core_type<tc>, window_params = [{transform_indices = @transform_0, window_bounds = array<i64: 1, 16, 4, 32>}, {transform_indices = @transform_1, window_bounds = array<i64: 1, 16, 4, 32>}, {transform_indices = @transform_2, window_bounds = array<i64: 1, 16, 4, 32>}, {transform_indices = @transform_3, window_bounds = array<i64: 1, 16, 128>}]} {
    %c0_i32 = arith.constant 0 : i32
    %0 = arith.cmpi eq, %arg2, %c0_i32 : i32
    %1 = arith.extui %0 : i1 to i32
    %c0_i32_0 = arith.constant 0 : i32
    %2 = arith.cmpi ne, %1, %c0_i32_0 : i32
    scf.if %2 {
      %cst_34 = arith.constant 0.000000e+00 : f32
      %78 = vector.broadcast %cst_34 : f32 to vector<4x32x33xf32>
      %c0_35 = arith.constant 0 : index
      %c0_36 = arith.constant 0 : index
      %c0_37 = arith.constant 0 : index
      %79 = vector.load %arg8[%c0_35, %c0_36, %c0_37] : memref<4x32x33xf32, #tpu.memory_space<vmem>>, vector<4x32x33xf32>
      tpu.vector_store %arg8[%c0_35, %c0_36, %c0_37], %78 {strides = array<i32>} : memref<4x32x33xf32, #tpu.memory_space<vmem>>, vector<4x32x33xf32>,
    } else {
    }
    %c0 = arith.constant 0 : index
    %c0_1 = arith.constant 0 : index
    %c0_2 = arith.constant 0 : index
    %c0_3 = arith.constant 0 : index
    %3 = vector.load %arg4[%c0, %c0_1, %c0_2, %c0_3] : memref<1x16x4x32xf32, #tpu.memory_space<vmem>>, vector<1x16x4x32xf32>
    %4 = vector.shape_cast %3 : vector<1x16x4x32xf32> to vector<16x4x32xf32>
    %cst = arith.constant 0.000000e+00 : f32
    %5 = vector.broadcast %cst : f32 to vector<16x4x32xf32>
    %6 = arith.cmpf ogt, %4, %5 : vector<16x4x32xf32>
    %cst_4 = arith.constant 1.000000e+00 : f32
    %7 = vector.broadcast %cst_4 : f32 to vector<16x4x32xf32>
    %8 = arith.addf %4, %7 : vector<16x4x32xf32>
    %cst_5 = arith.constant 0.000000e+00 : f32
    %9 = vector.broadcast %cst_5 : f32 to vector<16x4x32xf32>
    %10 = arith.minimumf %4, %9 : vector<16x4x32xf32>
    %11 = math.exp %10 : vector<16x4x32xf32>
    %12 = arith.select %6, %8, %11 : vector<16x4x32xi1>, vector<16x4x32xf32>
    %c16_i32 = arith.constant 16 : i32
    %13 = arith.muli %arg2, %c16_i32 : i32
    %14 = tpu.iota {dimensions = array<i32: 0>} : vector<16x1x1xi32>
    %15 = vector.broadcast %13 : i32 to vector<16x1x1xi32>
    %16 = arith.addi %15, %14 : vector<16x1x1xi32>
    %17 = arith.index_cast %arg0 : i32 to index
    %18 = memref.load %arg3[%17] : memref<2xi32, #tpu.memory_space<smem>>
    %19 = vector.broadcast %18 : i32 to vector<16x1x1xi32>
    %20 = arith.cmpi slt, %16, %19 : vector<16x1x1xi32>
    %21 = arith.extui %20 : vector<16x1x1xi1> to vector<16x1x1xi32>
    %22 = arith.sitofp %21 : vector<16x1x1xi32> to vector<16x1x1xf32>
    %c0_6 = arith.constant 0 : index
    %c0_7 = arith.constant 0 : index
    %c0_8 = arith.constant 0 : index
    %c0_9 = arith.constant 0 : index
    %23 = vector.load %arg5[%c0_6, %c0_7, %c0_8, %c0_9] : memref<1x16x4x32xf32, #tpu.memory_space<vmem>>, vector<1x16x4x32xf32>
    %24 = vector.shape_cast %23 : vector<1x16x4x32xf32> to vector<16x4x32xf32>
    %cst_10 = arith.constant 0.000000e+00 : f32
    %25 = vector.broadcast %cst_10 : f32 to vector<16x4x32xf32>
    %26 = arith.cmpf ogt, %24, %25 : vector<16x4x32xf32>
    %cst_11 = arith.constant 1.000000e+00 : f32
    %27 = vector.broadcast %cst_11 : f32 to vector<16x4x32xf32>
    %28 = arith.addf %24, %27 : vector<16x4x32xf32>
    %cst_12 = arith.constant 0.000000e+00 : f32
    %29 = vector.broadcast %cst_12 : f32 to vector<16x4x32xf32>
    %30 = arith.minimumf %24, %29 : vector<16x4x32xf32>
    %31 = math.exp %30 : vector<16x4x32xf32>
    %32 = arith.select %26, %28, %31 : vector<16x4x32xi1>, vector<16x4x32xf32>
    %33 = vector.broadcast %22 : vector<16x1x1xf32> to vector<16x4x32xf32>
    %34 = arith.mulf %32, %33 : vector<16x4x32xf32>
    %c0_13 = arith.constant 0 : index
    %c0_14 = arith.constant 0 : index
    %c0_15 = arith.constant 0 : index
    %c0_16 = arith.constant 0 : index
    %35 = vector.load %arg6[%c0_13, %c0_14, %c0_15, %c0_16] : memref<1x16x4x32xf32, #tpu.memory_space<vmem>>, vector<1x16x4x32xf32>
    %36 = vector.shape_cast %35 : vector<1x16x4x32xf32> to vector<16x4x32xf32>
    %37 = tpu.transpose %12, [1, 0, 2] : vector<16x4x32xf32> -> vector<4x16x32xf32>
    %38 = tpu.transpose %34, [1, 0, 2] : vector<16x4x32xf32> -> vector<4x16x32xf32>
    %39 = tpu.transpose %36, [1, 0, 2] : vector<16x4x32xf32> -> vector<4x16x32xf32>
    "tpu.trace_start"() <{level = 10 : i32, message = "hce,hke->hck"}> : () -> ()
    %cst_17 = arith.constant dense<0.000000e+00> : vector<4x16x16xf32>
    %40 = tpu.matmul %37, %38, %cst_17 {dimension_numbers = #tpu.dot_dimension_numbers<[2], [2], [1], [1], [0, 0, 0, 1, 1, 1], [0], [0]>} : vector<4x16x32xf32>, vector<4x16x32xf32>, vector<4x16x16xf32> -> vector<4x16x16xf32>
    "tpu.trace_stop"() : () -> ()
    %41 = tpu.iota {dimensions = array<i32: 0>} : vector<16x16xi32>
    %42 = tpu.iota {dimensions = array<i32: 1>} : vector<16x16xi32>
    %43 = arith.cmpi sge, %41, %42 : vector<16x16xi32>
    %44 = vector.shape_cast %43 : vector<16x16xi1> to vector<1x16x16xi1>
    %cst_18 = arith.constant 0.000000e+00 : f32
    %45 = vector.shape_cast %44 : vector<1x16x16xi1> to vector<1x16x16xi1>
    %46 = vector.broadcast %45 : vector<1x16x16xi1> to vector<4x16x16xi1>
    %47 = vector.broadcast %cst_18 : f32 to vector<4x16x16xf32>
    %48 = arith.select %46, %40, %47 : vector<4x16x16xi1>, vector<4x16x16xf32>
    %c0_19 = arith.constant 0 : index
    %c0_20 = arith.constant 0 : index
    %c0_21 = arith.constant 0 : index
    %49 = vector.load %arg8[%c0_19, %c0_20, %c0_21] : memref<4x32x33xf32, #tpu.memory_space<vmem>>, vector<4x32x33xf32>
    %cst_22 = arith.constant 1.000000e+00 : f32
    %50 = vector.broadcast %cst_22 : f32 to vector<4x16x1xf32>
    %51 = tpu.concatenate %39, %50 in 2 : vector<4x16x32xf32>, vector<4x16x1xf32> -> vector<4x16x33xf32>
    "tpu.trace_start"() <{level = 10 : i32, message = "hck,hkd->hcd"}> : () -> ()
    %cst_23 = arith.constant dense<0.000000e+00> : vector<4x16x33xf32>
    %52 = tpu.matmul %48, %51, %cst_23 {dimension_numbers = #tpu.dot_dimension_numbers<[2], [1], [1], [2], [0, 0, 0, 1, 1, 2], [0], [0]>} : vector<4x16x16xf32>, vector<4x16x33xf32>, vector<4x16x33xf32> -> vector<4x16x33xf32>
    "tpu.trace_stop"() : () -> ()
    "tpu.trace_start"() <{level = 10 : i32, message = "hce,hed->hcd"}> : () -> ()
    %cst_24 = arith.constant dense<0.000000e+00> : vector<4x16x33xf32>
    %53 = tpu.matmul %37, %49, %cst_24 {dimension_numbers = #tpu.dot_dimension_numbers<[2], [1], [1], [2], [0, 0, 0, 1, 1, 2], [0], [0]>} : vector<4x16x32xf32>, vector<4x32x33xf32>, vector<4x16x33xf32> -> vector<4x16x33xf32>
    "tpu.trace_stop"() : () -> ()
    %54 = arith.addf %52, %53 : vector<4x16x33xf32>
    %55 = vector.extract_strided_slice %54 {offsets = [0, 0, 32], sizes = [4, 16, 1], strides = [1, 1, 1]} : vector<4x16x33xf32> to vector<4x16x1xf32>
    %cst_25 = arith.constant 9.99999997E-7 : f32
    %56 = vector.broadcast %cst_25 : f32 to vector<4x16x1xf32>
    %57 = arith.addf %55, %56 : vector<4x16x1xf32>
    %58 = vector.extract_strided_slice %54 {offsets = [0, 0, 0], sizes = [4, 16, 32], strides = [1, 1, 1]} : vector<4x16x33xf32> to vector<4x16x32xf32>
    "tpu.trace_start"() <{level = 10 : i32, message = "hce,hcd->hed"}> : () -> ()
    %cst_26 = arith.constant dense<0.000000e+00> : vector<4x32x33xf32>
    %59 = tpu.matmul %38, %51, %cst_26 {dimension_numbers = #tpu.dot_dimension_numbers<[1], [1], [2], [2], [0, 0, 0, 2, 1, 2], [0], [0]>} : vector<4x16x32xf32>, vector<4x16x33xf32>, vector<4x32x33xf32> -> vector<4x32x33xf32>
    "tpu.trace_stop"() : () -> ()
    %60 = arith.addf %49, %59 : vector<4x32x33xf32>
    %c0_27 = arith.constant 0 : index
    %c0_28 = arith.constant 0 : index
    %c0_29 = arith.constant 0 : index
    %61 = vector.load %arg8[%c0_27, %c0_28, %c0_29] : memref<4x32x33xf32, #tpu.memory_space<vmem>>, vector<4x32x33xf32>
    tpu.vector_store %arg8[%c0_27, %c0_28, %c0_29], %60 {strides = array<i32>} : memref<4x32x33xf32, #tpu.memory_space<vmem>>, vector<4x32x33xf32>,
    %cst_30 = arith.constant 1.000000e+00 : f32
    %62 = vector.broadcast %cst_30 : f32 to vector<4x16x1xf32>
    %63 = arith.divf %62, %57 : vector<4x16x1xf32>
    %64 = vector.broadcast %63 : vector<4x16x1xf32> to vector<4x16x32xf32>
    %65 = arith.mulf %58, %64 : vector<4x16x32xf32>
    %66 = vector.extract_strided_slice %65 {offsets = [0, 0, 0], sizes = [1, 16, 32], strides = [1, 1, 1]} : vector<4x16x32xf32> to vector<1x16x32xf32>
    %67 = vector.shape_cast %66 : vector<1x16x32xf32> to vector<16x32xf32>
    %68 = vector.extract_strided_slice %65 {offsets = [1, 0, 0], sizes = [1, 16, 32], strides = [1, 1, 1]} : vector<4x16x32xf32> to vector<1x16x32xf32>
    %69 = vector.shape_cast %68 : vector<1x16x32xf32> to vector<16x32xf32>
    %70 = vector.extract_strided_slice %65 {offsets = [2, 0, 0], sizes = [1, 16, 32], strides = [1, 1, 1]} : vector<4x16x32xf32> to vector<1x16x32xf32>
    %71 = vector.shape_cast %70 : vector<1x16x32xf32> to vector<16x32xf32>
    %72 = vector.extract_strided_slice %65 {offsets = [3, 0, 0], sizes = [1, 16, 32], strides = [1, 1, 1]} : vector<4x16x32xf32> to vector<1x16x32xf32>
    %73 = vector.shape_cast %72 : vector<1x16x32xf32> to vector<16x32xf32>
    %74 = tpu.concatenate %67, %69, %71, %73 in 1 : vector<16x32xf32>, vector<16x32xf32>, vector<16x32xf32>, vector<16x32xf32> -> vector<16x128xf32>
    %c0_31 = arith.constant 0 : index
    %c0_32 = arith.constant 0 : index
    %c0_33 = arith.constant 0 : index
    %75 = vector.load %arg7[%c0_31, %c0_32, %c0_33] : memref<1x16x128xf32, #tpu.memory_space<vmem>>, vector<1x16x128xf32>
    %76 = vector.shape_cast %75 : vector<1x16x128xf32> to vector<16x128xf32>
    %77 = vector.shape_cast %74 : vector<16x128xf32> to vector<1x16x128xf32>
    tpu.vector_store %arg7[%c0_31, %c0_32, %c0_33], %77 {strides = array<i32>} : memref<1x16x128xf32, #tpu.memory_space<vmem>>, vector<1x16x128xf32>,
    return
  }
  func.func @transform_0(%arg0: i32, %arg1: i32, %arg2: i32, %arg3: memref<2xi32, #tpu.memory_space<smem>>) -> (i32, i32, i32, i32) {
    %c0_i32 = arith.constant 0 : i32
    %c0_i32_0 = arith.constant 0 : i32
    return %arg0, %arg2, %arg1, %c0_i32 : i32, i32, i32, i32
  }
  func.func @transform_1(%arg0: i32, %arg1: i32, %arg2: i32, %arg3: memref<2xi32, #tpu.memory_space<smem>>) -> (i32, i32, i32, i32) {
    %c0_i32 = arith.constant 0 : i32
    %c0_i32_0 = arith.constant 0 : i32
    return %arg0, %arg2, %arg1, %c0_i32 : i32, i32, i32, i32
  }
  func.func @transform_2(%arg0: i32, %arg1: i32, %arg2: i32, %arg3: memref<2xi32, #tpu.memory_space<smem>>) -> (i32, i32, i32, i32) {
    %c0_i32 = arith.constant 0 : i32
    %c0_i32_0 = arith.constant 0 : i32
    return %arg0, %arg2, %arg1, %c0_i32 : i32, i32, i32, i32
  }
  func.func @transform_3(%arg0: i32, %arg1: i32, %arg2: i32, %arg3: memref<2xi32, #tpu.memory_space<smem>>) -> (i32, i32, i32) {
    %c0_i32 = arith.constant 0 : i32
    return %arg0, %arg2, %arg1 : i32, i32, i32
  }
}

</mosaic_0001>

<bundles_post_ra>
// kernel: tpu_custom_call.1
= control target key start
LH: loop header
LB: loop body
LE: loop exit
PB: predicated region body
PF: predicated region fallthrough
CT: control target
= control target key end

     0   :  { %s4770_s0 = inlined_call_operand.hbm [shape: s32[2], index: 0, kind: input, shape index: {}]   ;;  %s4771_s1 = inlined_call_operand.hbm [shape: f32[2,16,4,32], index: 1, kind: input, shape index: {}]   ;;  %s4772_s2 = inlined_call_operand.hbm [shape: f32[2,16,4,32], index: 2, kind: input, shape index: {}]   ;;  %s4773_s3 = inlined_call_operand.hbm [shape: f32[2,16,4,32], index: 3, kind: input, shape index: {}]   ;;  %s4774_s4 = inlined_call_operand.hbm [shape: f32[2,16,128], index: 4, kind: output, shape index: {}]  }
   0x1   :  { %4789 = sst [smem:[#allocation34_spill]] %s4772_s2  ;;  %s3500_s17 = scalar_lea.hbm %s4770_s0, 16 }
   0x2   :  { %p3501_p0 = scmp.ne.s32.totalorder %s4770_s0, %s3500_s17  ;;  %p3504_p1 = scmp.lt.u32.totalorder %s3500_s17, %s4770_s0 }
   0x4   :  { %p3506_p2 = pnand %p3504_p1, %p3501_p0 }
   0x6   :  { %3509 = shalt.err (!%p3506_p2)  }
   0x7   :  { %s3690_s22 = smov [#allocation4]  }
   0x8   :  { %10 = dma.hbm_to_smem %s4770_s0, 16, %s3690_s22, [#allocation3] }
   0x9   :  { %3652 = dma.done.wait [#allocation3], 16 }
   0xa   :  { %3653 = vsyncadd [#allocation3], 4294967280 }
   0xb   :  { %12 = sfence }
   0xc   :  { %13 = vsyncpa [#allocation6], 0 }
   0xd   :  { %15 = vsyncpa [#allocation6 + $0x1], 0 }
   0xe   :  { %16 = vsyncpa [#allocation9], 0 }
   0xf   :  { %18 = vsyncpa [#allocation9 + $0x1], 0 }
  0x10   :  { %19 = vsyncpa [#allocation7], 0 }
  0x11   :  { %21 = vsyncpa [#allocation7 + $0x1], 0  ;;  %s3743_s25 = smov 0   ;;  %s3745_s26 = smov 0  }
  0x12   :  { %s3747_s27 = smov 0   ;;  %s3749_s28 = smov 0  }
  0x13   :  { %s3751_s29 = smov 0   ;;  %s3753_s0 = smov 0  }
  0x14 LB: > { %4790 = sst [smem:[#allocation16_spill]] %s3684_s29  ;;  %s3774_s30 = sadd.s32 4294967295, %s3688_s0   ;;  %s3688_s0 = sphi %s3753_s0, %s27_s0   ;;  %s3684_s29 = sphi %s3751_s29, %s4863_s29   ;;  %s3680_s28 = sphi %s3749_s28, %s4862_s28   ;;  %s3676_s27 = sphi %s3747_s27, %s4866_s27   ;;  %s3672_s26 = sphi %s3745_s26, %s4865_s26   ;;  %s3668_s25 = sphi %s3743_s25, %s4864_s25  }
  0x15   : > { %s2904_s5 = sadd.s32 4294967294, %s3688_s0   ;;  %s46_s6 = sadd.s32 1, %s3684_s29 }
  0x16   : > { %s57_s7 = sadd.s32 1, %s3676_s27  ;;  %p48_p3 = scmp.ge.s32.totalorder %s46_s6, 2 }
  0x17   : > { %p64_p4 = scmp.ne.s32.totalorder %s3676_s27, %s3672_s26  ;;  %p65_p5 = scmp.eq.s32.totalorder %s3688_s0, 0 }
  0x18   : > { %p70_p6 = scmp.ne.s32.totalorder %s3672_s26, %s3668_s25  ;;  %s4868_s6 = smov (%p48_p3, %s46_s6), 0 }
  0x19   : > { %4791 = sst [smem:[#allocation17_spill]] %s4868_s6  ;;  %p3786_p7 = por %p65_p5, %p64_p4 }
  0x1a   : > { %p71_p8 = scmp.eq.s32.totalorder %s3774_s30, 0  ;;  %s50_s9 = ssub.s32 %s3684_s29, %s4868_s6 }
  0x1b   : > { %p158_p9 = scmp.eq.s32.totalorder %s3774_s30, 1  ;;  %p55_p10 = scmp.eq.s32.totalorder %s50_s9, 0 }
  0x1c   : > { %p3794_p11 = por %p71_p8, %p70_p6  ;;  %p164_p13 = scmp.eq.s32.totalorder %s2904_s5, 1 }
  0x1d   : > { %p3798_p12 = por %p158_p9, %p64_p4  ;;  %p3348_p2 = scmp.lt.s32.totalorder %s3688_s0, 2 }
  0x1e   : > { %s4793_s10 = scalar_select %p3794_p11, 1, 0 }
  0x1f   : > { %s4794_s11 = scalar_select %p3798_p12, 1, 0 }
  0x20   : > { %s3803_s12 = scalar_select %p55_p10, %s3676_s27, %s57_s7  }
  0x21   : > { %p3805_p0 = por %p164_p13, %p70_p6  ;;  %s4777_s14 = sand.u32 1, %s3676_s27  }
  0x22   : > { %4795 = sst [smem:[#allocation18_spill]] %s3803_s12  ;;  %s3814_s15 = sshll.u32 %s4777_s14, 6 }
  0x23   : > { %s4796_s13 = scalar_select %p3805_p0, 1, 0 }
  0x24   : > { %s3817_s16 = sshll.u32 %s3684_s29, 10  ;;  %p3821_p3 = pnand %p3348_p2, %p3786_p7 }
  0x25   : > { %s208_s18 = sand.u32 1, %s3688_s0   ;;  %s4798_s2 = sld [smem:[#allocation34_spill]] }
  0x26   : > { %s212_s22 = scalar_lea.vmem [#allocation8], %s3814_s15  ;;  %s3837_s24 = scalar_lea.sflag [#allocation9], %s208_s18 }
  0x27   : > { %s222_s23 = sshll.u32 %s212_s22, 4  ;;  %p3843_p7 = pneg %p3821_p3  ;;  %s3834_s23 = int_to_ptr.vmem [resolvable:$true] %s222_s23 }
  0x2b   : > { %s3830_s21 = scalar_lea.hbm %s4798_s2, %s3817_s16  ;;  %s3515_s19 = scalar_lea.hbm %s4798_s2, 2048 }
  0x2c   : > { %s3510_s5 = scalar_lea.hbm %s3830_s21, 1024  ;;  %p3516_p10 = scmp.lt.u32.totalorder %s3830_s21, %s4798_s2 }
  0x2d   : > { %p3511_p6 = scmp.ne.s32.totalorder %s3830_s21, %s3510_s5  ;;  %p3517_p13 = scmp.lt.u32.totalorder %s3515_s19, %s3510_s5 }
  0x2e   : > { %p3519_p1 = scmp.lt.u32.totalorder %s3510_s5, %s3830_s21 }
  0x2f   : > { %p3513_p8 = pnand %p3843_p7, %p3511_p6  ;;  %p3518_p2 = por %p3517_p13, %p3516_p10 }
  0x31   : > { %p3514_p9 = pneg %p3513_p8  ;;  %p3520_p4 = por %p3519_p1, %p3518_p2 }
  0x33   : > { %p3521_p5 = pnand %p3520_p4, %p3514_p9 }
  0x35   : > { %3524 = shalt.err (!%p3521_p5)
}
  0x36   : > { %s3525_s18 = scalar_lea.vmem %s3834_s23, 1024  ;;  %s3691_s8 = smov [#allocation8]  }
  0x37   : > { %p3526_p6 = scmp.ne.s32.totalorder %s3834_s23, %s3525_s18  ;;  %s3530_s9 = sshll.u32 %s3691_s8, 4  ;;  %s3531_s9 = int_to_ptr.vmem [resolvable:$false] %s3530_s9 }
  0x38   : > { %s3532_s20 = scalar_lea.vmem %s3531_s9, 2048  ;;  %p3533_p12 = scmp.lt.s32.totalorder %s3834_s23, %s3531_s9 }
  0x39   : > { %p3528_p8 = pnand %p3526_p6, %p3843_p7  ;;  %p3534_p11 = scmp.lt.s32.totalorder %s3532_s20, %s3525_s18 }
  0x3b   : > { %p3529_p0 = pneg %p3528_p8  ;;  %p3535_p10 = por %p3534_p11, %p3533_p12 }
  0x3d   : > { %p3536_p13 = pnand %p3535_p10, %p3529_p0 }
  0x3f   : > { %3539 = shalt.err (!%p3536_p13)
}
  0x40   : > { %s4778_s5 = smov 64   ;;  %s4780_s19 = smov 4  }
  0x41   : > { %3340 = dma.hbm_to_vmem [thread:$0]  (!%p3821_p3), %s3830_s21, 1024, %s3834_s23, %s3837_s24, %s4778_s5, %s4778_s5, %s4780_s19  }
  0x42   : > { %p4800_p11 = scmp.lt.s32.totalorder %s3688_s0, 3  ;;  %p4801_p12 = scmp.ge.s32.totalorder %s3688_s0, 1 }
  0x43   : > { %s3882_s9 = scalar_lea.hbm %s4771_s1, %s3817_s16  ;;  %s188_s20 = scalar_lea.vmem [#allocation5], %s3814_s15 }
  0x44   : > { %p3874_p0 = pnand %p4801_p12, %p4800_p11  ;;  %s198_s14 = sshll.u32 %s188_s20, 4  ;;  %s3885_s14 = int_to_ptr.vmem [resolvable:$true] %s198_s14 }
  0x45   : > { %s3891_s5 = scalar_lea.hbm %s4773_s3, %s3817_s16  ;;  %s4803_s19 = sand.u32 1, %s3676_s27  }
  0x46   : > { %s4802_s22 = scalar_select %p3874_p0, 1, 0 }
  0x47   : > { %s3895_s2 = scalar_lea.sflag [#allocation6], %s4803_s19  ;;  %s3540_s6 = scalar_lea.hbm %s3882_s9, 1024 }
  0x48   : > { %p3541_p1 = scmp.ne.s32.totalorder %s3882_s9, %s3540_s6  ;;  %s3545_s29 = scalar_lea.hbm %s4771_s1, 2048 }
  0x49   : > { %p3546_p9 = scmp.lt.u32.totalorder %s3882_s9, %s4771_s1  ;;  %p3547_p2 = scmp.lt.u32.totalorder %s3545_s29, %s3540_s6 }
  0x4a   : > { %p3543_p4 = pnand %p3541_p1, %p3843_p7  ;;  %p3549_p8 = scmp.lt.u32.totalorder %s3540_s6, %s3882_s9 }
  0x4b   : > { %p3548_p6 = por %p3547_p2, %p3546_p9 }
  0x4c   : > { %p3544_p5 = pneg %p3543_p4 }
  0x4d   : > { %p3550_p10 = por %p3549_p8, %p3548_p6 }
  0x4f   : > { %p3551_p13 = pnand %p3550_p10, %p3544_p5 }
  0x51   : > { %3554 = shalt.err (!%p3551_p13)
}
  0x52   : > { %s3555_s16 = scalar_lea.vmem %s3885_s14, 1024  ;;  %s3694_s19 = smov [#allocation5]  }
  0x53   : > { %p3556_p11 = scmp.ne.s32.totalorder %s3885_s14, %s3555_s16  ;;  %s3560_s21 = sshll.u32 %s3694_s19, 4  ;;  %s3561_s21 = int_to_ptr.vmem [resolvable:$false] %s3560_s21 }
  0x54   : > { %s3562_s12 = scalar_lea.vmem %s3561_s21, 2048  ;;  %p3563_p4 = scmp.lt.s32.totalorder %s3885_s14, %s3561_s21 }
  0x55   : > { %p3558_p12 = pnand %p3556_p11, %p3843_p7  ;;  %p3564_p0 = scmp.lt.s32.totalorder %s3562_s12, %s3555_s16 }
  0x57   : > { %p3559_p1 = pneg %p3558_p12  ;;  %p3565_p9 = por %p3564_p0, %p3563_p4 }
  0x59   : > { %p3566_p2 = pnand %p3565_p9, %p3559_p1 }
  0x5b   : > { %3569 = shalt.err (!%p3566_p2)
}
  0x5c   : > { %s4804_s29 = smov 4   ;;  %s4805_s6 = smov 64  }
  0x5d   : > { %3337 = dma.hbm_to_vmem [thread:$0]  (!%p3821_p3), %s3882_s9, 1024, %s3885_s14, %s3895_s2, %s4805_s6, %s4805_s6, %s4804_s29  }
  0x5e   : > { %s236_s23 = scalar_lea.vmem [#allocation10], %s3814_s15  ;;  %s3570_s8 = scalar_lea.hbm %s3891_s5, 1024 }
  0x5f   : > { %s246_s18 = sshll.u32 %s236_s23, 4  ;;  %p3571_p0 = scmp.ne.s32.totalorder %s3891_s5, %s3570_s8  ;;  %s3923_s18 = int_to_ptr.vmem [resolvable:$true] %s246_s18 }
  0x60   : > { %s3575_s19 = scalar_lea.hbm %s4773_s3, 2048  ;;  %p3576_p8 = scmp.lt.u32.totalorder %s3891_s5, %s4773_s3 }
  0x61   : > { %p3573_p5 = pnand %p3571_p0, %p3843_p7  ;;  %p3577_p10 = scmp.lt.u32.totalorder %s3575_s19, %s3570_s8 }
  0x62   : > { %p3579_p11 = scmp.lt.u32.totalorder %s3570_s8, %s3891_s5 }
  0x63   : > { %p3574_p6 = pneg %p3573_p5  ;;  %p3578_p13 = por %p3577_p10, %p3576_p8 }
  0x65   : > { %p3580_p12 = por %p3579_p11, %p3578_p13 }
  0x67   : > { %p3581_p1 = pnand %p3580_p12, %p3574_p6 }
  0x69   : > { %3584 = shalt.err (!%p3581_p1)
}
  0x6a   : > { %s3585_s2 = scalar_lea.vmem %s3923_s18, 1024  ;;  %s3695_s14 = smov [#allocation10]  }
  0x6b   : > { %p3586_p4 = scmp.ne.s32.totalorder %s3923_s18, %s3585_s2  ;;  %s3590_s15 = sshll.u32 %s3695_s14, 4  ;;  %s3591_s15 = int_to_ptr.vmem [resolvable:$false] %s3590_s15 }
  0x6c   : > { %s3592_s9 = scalar_lea.vmem %s3591_s15, 2048  ;;  %p3593_p0 = scmp.lt.s32.totalorder %s3923_s18, %s3591_s15 }
  0x6d   : > { %p3588_p9 = pnand %p3586_p4, %p3843_p7  ;;  %p3594_p5 = scmp.lt.s32.totalorder %s3592_s9, %s3585_s2 }
  0x6f   : > { %p3589_p2 = pneg %p3588_p9  ;;  %p3595_p8 = por %p3594_p5, %p3593_p0 }
  0x71   : > { %p3596_p10 = pnand %p3595_p8, %p3589_p2 }
  0x73   : > { %3599 = shalt.err (!%p3596_p10)
}
  0x74   : > { %3343 = dma.hbm_to_vmem [thread:$0]  (!%p3821_p3), %s3891_s5, 1024, %s3923_s18, %s3837_s24, %s4805_s6, %s4805_s6, %s4804_s29  }
  0x75   : > { %p4806_p7 = scmp.ne.s32.totalorder %s4802_s22, 0 }
  0x77   : > { %258 = sbr.rel (%p4806_p7) target bundleno = 947 (0x3b3), region = 32 }
  0x7e   : > { %s3953_s7 = sand.u32 1, %s3672_s26   ;;  %p4807_p6 = scmp.ne.s32.totalorder %s4793_s10, 0 }
  0x7f   : > { %s3956_s23 = sshll.u32 %s3953_s7, 6  ;;  %s261_s17 = scalar_lea.sflag [#allocation6], %s3953_s7 }
  0x80   : > { %s3960_s8 = scalar_lea.vmem [#allocation5], %s3956_s23 }
  0x81   : > { %3655 = dma.done.wait (%p4807_p6), %s261_s17, 1024  }
  0x82   : > { %3657 = vsyncadd (%p4807_p6), %s261_s17, 4294966272  ;;  %s269_s24 = sand.u32 1, %s3774_s30   ;;  %s3968_s22 = scalar_lea.vmem [#allocation8], %s3956_s23 }
  0x83   : > { %s270_s5 = scalar_lea.sflag [#allocation9], %s269_s24 }
  0x84   : > { %3659 = dma.done.wait (%p4807_p6), %s270_s5, 2048  }
  0x85   : > { %3661 = vsyncadd (%p4807_p6), %s270_s5, 4294965248  ;;  %vm4784_vm0 = vcmask 269312   ;;  %v3696_v0 = vmov 0.0   ;;  %s469_s30 = sld [smem:[#allocation4 + %s3680_s28]]  ;;  %v3697_v1 = vmov 1983009808   ;;  %v4785_v3 = vlaneseq }
  0x86   : > { %324 = vst.msk [vmem:[#allocation2] sm:$0xff] %vm4784_vm0, %v3696_v0  ;;  %325 = vst.msk [vmem:[#allocation2 + $0x8] sm:$0xff] %vm4784_vm0, %v3696_v0  ;;  %v665_v2 = vunpack.c.l.s4 %v3697_v1  ;;  %v3698_v4 = vmov 1934713408   ;;  %v4017_v12 = vld [vmem:[%s3968_s22] sm:$0xf] }
  0x87   : > { %326 = vst.msk [vmem:[#allocation2 + $0x10] sm:$0xff] %vm4784_vm0, %v3696_v0  ;;  %327 = vst.msk [vmem:[#allocation2 + $0x18] sm:$0xff] %vm4784_vm0, %v3696_v0  ;;  %v698_v5 = vunpack.c.l.s4 %v3698_v4  ;;  %v4008_v7 = vshrl.u32 %v4785_v3, 7  ;;  %v4020_v13 = vld [vmem:[%s3968_s22 + $0x4] sm:$0xf]  ;;  %v4108_v37 = vadd.f32 1.0, %v4017_v12 }
  0x88   : > { %328 = vst.msk [vmem:[#allocation2 + $0x20] sm:$0xff] %vm4784_vm0, %v3696_v0  ;;  %329 = vst.msk [vmem:[#allocation2 + $0x28] sm:$0xff] %vm4784_vm0, %v3696_v0  ;;  %v666_v6 = vunpack.c.0.s8 %v665_v2  ;;  %v4035_v17 = vld [vmem:[%s3968_s22 + $0x8] sm:$0xf]  ;;  %v4038_v18 = vld [vmem:[%s3968_s22 + $0xc] sm:$0xf] }
  0x89   : > { %330 = vst.msk [vmem:[#allocation2 + $0x30] sm:$0xff] %vm4784_vm0, %v3696_v0  ;;  %331 = vst.msk [vmem:[#allocation2 + $0x38] sm:$0xff] %vm4784_vm0, %v3696_v0  ;;  %v699_v8 = vunpack.c.0.s8 %v698_v5  ;;  %v4057_v23 = vld [vmem:[%s3968_s22 + $0x10] sm:$0xf]  ;;  %v4076_v28 = vld [vmem:[%s3968_s22 + $0x14] sm:$0xf] }
  0x8a   : > { %332 = vst.msk [vmem:[#allocation2 + $0x40] sm:$0xff] %vm4784_vm0, %v3696_v0  ;;  %333 = vst.msk [vmem:[#allocation2 + $0x48] sm:$0xff] %vm4784_vm0, %v3696_v0  ;;  %v4011_v10 = vsub.s32 %v666_v6, %v4008_v7  ;;  %v4095_v33 = vld [vmem:[%s3968_s22 + $0x18] sm:$0xf]  ;;  %v4102_v35 = vld [vmem:[%s3968_s22 + $0x1c] sm:$0xf] }
  0x8b   : > { %334 = vst.msk [vmem:[#allocation2 + $0x50] sm:$0xff] %vm4784_vm0, %v3696_v0  ;;  %335 = vst.msk [vmem:[#allocation2 + $0x58] sm:$0xff] %vm4784_vm0, %v3696_v0  ;;  %v470_v9 = vstv %s469_s30  ;;  %v4014_v11 = vsub.s32 %v699_v8, %v4008_v7  ;;  %v4105_v36 = vld [vmem:[%s3968_s22 + $0x20] sm:$0xf]  ;;  %v567_v38 = vmin.f32 %v4017_v12, 0.0  ;;  %v568_v39 = vmin.f32 %v4020_v13, 0.0 }
  0x8c   : > { %336 = vst.msk [vmem:[#allocation2 + $0x60] sm:$0xff] %vm4784_vm0, %v3696_v0  ;;  %337 = vst.msk [vmem:[#allocation2 + $0x68] sm:$0xff] %vm4784_vm0, %v3696_v0  ;;  %vm2921_vm1 = vcmp.gt.s32.totalorder %v470_v9, 0  ;;  %vm2922_vm2 = vcmp.gt.s32.totalorder %v470_v9, 1  ;;  %vm2923_vm3 = vcmp.gt.s32.totalorder %v470_v9, 2  ;;  %vm2924_vm4 = vcmp.gt.s32.totalorder %v470_v9, 3 }
  0x8d   : > { %338 = vst.msk [vmem:[#allocation2 + $0x70] sm:$0xff] %vm4784_vm0, %v3696_v0  ;;  %339 = vst.msk [vmem:[#allocation2 + $0x78] sm:$0xff] %vm4784_vm0, %v3696_v0  ;;  %vm2925_vm5 = vcmp.gt.s32.totalorder %v470_v9, 4  ;;  %vm2926_vm6 = vcmp.gt.s32.totalorder %v470_v9, 5  ;;  %vm2927_vm7 = vcmp.gt.s32.totalorder %v470_v9, 6  ;;  %vm2928_vm8 = vcmp.gt.s32.totalorder %v470_v9, 7 }
  0x8e   : > { %4808 = vst [vmem:[#allocation19_spill] sm:$0xff] %v4008_v7  ;;  %4809 = vst [vmem:[#allocation20_spill] sm:$0xff] %v4014_v11  ;;  %vm2929_vm9 = vcmp.gt.s32.totalorder %v470_v9, 8  ;;  %vm2930_vm10 = vcmp.gt.s32.totalorder %v470_v9, 9  ;;  %vm2931_vm11 = vcmp.gt.s32.totalorder %v470_v9, 10  ;;  %vm2932_vm12 = vcmp.gt.s32.totalorder %v470_v9, 11 }
  0x8f   : > { %vm2933_vm13 = vcmp.gt.s32.totalorder %v470_v9, 12  ;;  %vm2934_vm14 = vcmp.gt.s32.totalorder %v470_v9, 13  ;;  %vm2935_vm15 = vcmp.gt.s32.totalorder %v470_v9, 14  ;;  %vm2936_vm0 = vcmp.gt.s32.totalorder %v470_v9, 15  ;;  %v4113_v40 = vld [vmem:[%s3968_s22 + $0x24] sm:$0xf] }
  0x90   : > { %v4024_v14 = vsel %vm2921_vm1, 1.0, %v3696_v0  ;;  %v4028_v15 = vsel %vm2922_vm2, 1.0, %v3696_v0  ;;  %v4032_v16 = vsel %vm2923_vm3, 1.0, %v3696_v0  ;;  %v4042_v19 = vsel %vm2924_vm4, 1.0, %v3696_v0  ;;  %v4124_v45 = vld [vmem:[%s3968_s22 + $0x28] sm:$0xf] }
  0x91   : > { %v4046_v20 = vsel %vm2925_vm5, 1.0, %v3696_v0  ;;  %v4050_v21 = vsel %vm2926_vm6, 1.0, %v3696_v0  ;;  %v4054_v22 = vsel %vm2927_vm7, 1.0, %v3696_v0  ;;  %v4061_v24 = vsel %vm2928_vm8, 1.0, %v3696_v0  ;;  %v4137_v50 = vld [vmem:[%s3968_s22 + $0x2c] sm:$0xf] }
  0x92   : > { %v4065_v25 = vsel %vm2929_vm9, 1.0, %v3696_v0  ;;  %v4069_v26 = vsel %vm2930_vm10, 1.0, %v3696_v0  ;;  %v4073_v27 = vsel %vm2931_vm11, 1.0, %v3696_v0  ;;  %v4080_v29 = vsel %vm2932_vm12, 1.0, %v3696_v0  ;;  %v4140_v51 = vld [vmem:[%s3968_s22 + $0x30] sm:$0xf] }
  0x93   : > { %4810 = vst [vmem:[#allocation21_spill] sm:$0xff] %v4080_v29  ;;  %v4084_v30 = vsel %vm2933_vm13, 1.0, %v3696_v0  ;;  %v4088_v31 = vsel %vm2934_vm14, 1.0, %v3696_v0  ;;  %v4092_v32 = vsel %vm2935_vm15, 1.0, %v3696_v0  ;;  %v4099_v34 = vsel %vm2936_vm0, 1.0, %v3696_v0  ;;  %s282_s10 = scalar_lea.vmem [#allocation10], %s3956_s23 }
  0x94   : > { %4811 = vst [vmem:[#allocation22_spill] sm:$0xff] %v4084_v30  ;;  %4812 = vst [vmem:[#allocation23_spill] sm:$0xff] %v4088_v31  ;;  %v4116_v41 = vadd.f32 1.0, %v4020_v13  ;;  %v4119_v42 = vadd.f32 1.0, %v4035_v17  ;;  %v569_v43 = vmin.f32 %v4035_v17, 0.0  ;;  %v570_v44 = vmin.f32 %v4038_v18, 0.0 }
  0x95   : > { %4813 = vst [vmem:[#allocation24_spill] sm:$0xff] %v4092_v32  ;;  %4814 = vst [vmem:[#allocation25_spill] sm:$0xff] %v4099_v34  ;;  %v4127_v46 = vadd.f32 1.0, %v4038_v18  ;;  %v4130_v47 = vadd.f32 1.0, %v4057_v23  ;;  %v4133_v48 = vadd.f32 1.0, %v4076_v28  ;;  %v571_v49 = vmin.f32 %v4057_v23, 0.0 }
  0x96   : > { %v4143_v52 = vadd.f32 1.0, %v4095_v33  ;;  %v4146_v53 = vadd.f32 1.0, %v4102_v35  ;;  %v4149_v54 = vadd.f32 1.0, %v4105_v36  ;;  %v572_v55 = vmin.f32 %v4076_v28, 0.0  ;;  %v4153_v56 = vld [vmem:[%s3968_s22 + $0x34] sm:$0xf] }
  0x97   : > { %v4156_v57 = vadd.f32 1.0, %v4113_v40  ;;  %v573_v58 = vmin.f32 %v4095_v33, 0.0  ;;  %v583_v59 = vmul.f32 1.442695, %v567_v38  ;;  %v585_v60 = vmul.f32 1.442695, %v568_v39 }
  0x98   : > { %v4160_v61 = vadd.f32 1.0, %v4124_v45  ;;  %v574_v62 = vmin.f32 %v4102_v35, 0.0  ;;  %v587_v63 = vmul.f32 1.442695, %v569_v43  ;;  %v589_v0 = vmul.f32 1.442695, %v570_v44 }
  0x99   : > { %v4164_v1 = vld [vmem:[%s3968_s22 + $0x38] sm:$0xf]  ;;  %vm535_vm0 = vcmp.gt.f32.partialorder %v4017_v12, 0.0  ;;  %v4168_v2 = vadd.f32 1.0, %v4137_v50  ;;  %v575_v4 = vmin.f32 %v4105_v36, 0.0  ;;  %3420 = vpow2.f32 %v583_v59  ;;  %s3700_s29 = smov 32  }
  0x9a   : > { %v591_v5 = vmul.f32 1.442695, %v571_v49  ;;  %v4172_v6 = vld [vmem:[%s3968_s22 + $0x3c] sm:$0xf]  ;;  %vm536_vm1 = vcmp.gt.f32.partialorder %v4020_v13, 0.0  ;;  %v576_v8 = vmin.f32 %v4113_v40, 0.0  ;;  %3422 = vpow2.f32 %v585_v60 }
  0x9b   : > { %v577_v9 = vmin.f32 %v4124_v45, 0.0  ;;  %v593_v38 = vmul.f32 1.442695, %v572_v55  ;;  %vm537_vm2 = vcmp.gt.f32.partialorder %v4035_v17, 0.0  ;;  %v578_v39 = vmin.f32 %v4137_v50, 0.0  ;;  %s3701_s6 = smov 64  }
  0x9c   : > { %v579_v43 = vmin.f32 %v4140_v51, 0.0  ;;  %3424 = vpow2.f32 %v587_v63  ;;  %v595_v44 = vmul.f32 1.442695, %v573_v58  ;;  %vm538_vm3 = vcmp.gt.f32.partialorder %v4038_v18, 0.0  ;;  %v4189_v63 = vld [vmem:[%s3960_s8] sm:$0xf] }
  0x9d   : > { %v580_v49 = vmin.f32 %v4153_v56, 0.0  ;;  %v581_v59 = vmin.f32 %v4164_v1, 0.0  ;;  %3426 = vpow2.f32 %v589_v0  ;;  %v597_v55 = vmul.f32 1.442695, %v574_v62  ;;  %v4192_v7 = vld [vmem:[%s3960_s8 + $0x4] sm:$0xf] }
  0x9e   : > { %vm539_vm4 = vcmp.gt.f32.partialorder %v4057_v23, 0.0  ;;  %v4185_v60 = vadd.f32 1.0, %v4140_v51  ;;  %v582_v3 = vmin.f32 %v4172_v6, 0.0  ;;  %3428 = vpow2.f32 %v591_v5  ;;  %v4202_v32 = vld [vmem:[%s3960_s8 + $0x8] sm:$0xf]  ;;  %s3702_s18 = smov 96  }
  0x9f   : > { %v599_v58 = vmul.f32 1.442695, %v575_v4  ;;  %vm540_vm5 = vcmp.gt.f32.partialorder %v4076_v28, 0.0  ;;  %v4196_v34 = vadd.f32 1.0, %v4153_v56  ;;  %v4199_v62 = vadd.f32 1.0, %v4164_v1  ;;  %s2920_s20 = sshll.u32 %s3953_s7, 4 }
  0xa0   : > { %4815 = vst [vmem:[#allocation26_spill] sm:$0xff] %v4185_v60  ;;  %3430 = vpow2.f32 %v593_v38  ;;  %v601_v0 = vmul.f32 1.442695, %v576_v8  ;;  %v4205_v5 = vld [vmem:[%s3960_s8 + $0xc] sm:$0xf]  ;;  %vm541_vm6 = vcmp.gt.f32.partialorder %v4095_v33, 0.0 }
  0xa1   : > { %4816 = vst [vmem:[#allocation27_spill] sm:$0xff] %v4196_v34  ;;  %4817 = vst [vmem:[#allocation28_spill] sm:$0xff] %v4199_v62  ;;  %v4209_v4 = vadd.f32 1.0, %v4172_v6  ;;  %3432 = vpow2.f32 %v595_v44  ;;  %v603_v31 = vmul.f32 1.442695, %v577_v9  ;;  %vm542_vm7 = vcmp.gt.f32.partialorder %v4102_v35, 0.0 }
  0xa2   : > { %v605_v11 = vmul.f32 1.442695, %v578_v39  ;;  %v4212_v30 = vld [vmem:[%s3960_s8 + $0x10] sm:$0xf]  ;;  %3434 = vpow2.f32 %v597_v55  ;;  %v607_v38 = vmul.f32 1.442695, %v579_v43 }
  0xa3   : > { %4818 = vst [vmem:[#allocation29_spill] sm:$0xff] %v4209_v4  ;;  %v609_v8 = vmul.f32 1.442695, %v580_v49  ;;  %v611_v62 = vmul.f32 1.442695, %v581_v59  ;;  %vm543_vm8 = vcmp.gt.f32.partialorder %v4105_v36, 0.0  ;;  %3436 = vpow2.f32 %v599_v58  ;;  %v3421_v49 = vpop.eup %3420 }
  0xa4   : > { %v613_v34 = vmul.f32 1.442695, %v582_v3  ;;  %v4217_v29 = vld [vmem:[%s3960_s8 + $0x14] sm:$0xf]  ;;  %v4220_v60 = vadd.f32 1.0, %v4189_v63  ;;  %v4223_v9 = vadd.f32 1.0, %v4192_v7  ;;  %3438 = vpow2.f32 %v601_v0  ;;  %v3423_v58 = vpop.eup %3422 }
  0xa5   : > { %vm544_vm9 = vcmp.gt.f32.partialorder %v4113_v40, 0.0  ;;  %v4227_v39 = vadd.f32 1.0, %v4202_v32  ;;  %v388_v43 = vmin.f32 %v4189_v63, 0.0  ;;  %v389_v44 = vmin.f32 %v4192_v7, 0.0  ;;  %s314_s16 = scalar_lea.vmem [#allocation11], %s2920_s20  ;;  %s3009_s21 = sshll.u32 %s3680_s28, 8 }
  0xa6   : > { %4819 = vst [vmem:[#allocation30_spill] sm:$0xff] %v4220_v60  ;;  %4820 = vst [vmem:[#allocation31_spill] sm:$0xff] %v4223_v9  ;;  %vm545_vm10 = vcmp.gt.f32.partialorder %v4124_v45, 0.0  ;;  %3440 = vpow2.f32 %v603_v31  ;;  %v4233_v3 = vadd.f32 1.0, %v4205_v5  ;;  %v390_v59 = vmin.f32 %v4202_v32, 0.0  ;;  %v3425_v31 = vpop.eup %3424  ;;  %s2760_s19 = sshll.u32 %s314_s16, 4  ;;  %s4720_s14 = scalar_lea.hbm %s4774_s4, %s3009_s21  ;;  %s4714_s19 = int_to_ptr.vmem [resolvable:$true] %s2760_s19 }
  0xa7   : > { %4821 = vst [vmem:[#allocation32_spill] sm:$0xff] %v4227_v39  ;;  %v391_v55 = vmin.f32 %v4205_v5, 0.0  ;;  %vm546_vm11 = vcmp.gt.f32.partialorder %v4137_v50, 0.0  ;;  %3442 = vpow2.f32 %v605_v11  ;;  %v615_v0 = vsel %vm535_vm0, %v4108_v37, %v3421_v49  ;;  %v3427_v11 = vpop.eup %3426  ;;  %s2744_s28 = scalar_lea.sflag [#allocation7], %s3953_s7  ;;  %s3600_s15 = scalar_lea.vmem %s4714_s19, 256 }
  0xa8   : > { %4822 = vst [vmem:[#allocation33_spill] sm:$0xff] %v4233_v3  ;;  %v392_v39 = vmin.f32 %v4212_v30, 0.0  ;;  %vm547_vm12 = vcmp.gt.f32.partialorder %v4140_v51, 0.0  ;;  %3444 = vpow2.f32 %v607_v38  ;;  %v616_v3 = vsel %vm536_vm1, %v4116_v41, %v3423_v58  ;;  %v3429_v9 = vpop.eup %3428  ;;  %v4828_v51 = vld [vmem:[#allocation28_spill] sm:$0xff]  ;;  %p3601_p3 = scmp.ne.s32.totalorder %s4714_s19, %s3600_s15  ;;  %p4858_p13 = scmp.ne.s32.totalorder %s4794_s11, 0 }
  0xa9   : > { %v631_v60 = vmul.f32 %v4024_v14, %v615_v0  ;;  %v404_v4 = vmul.f32 1.442695, %v388_v43  ;;  %vm548_vm13 = vcmp.gt.f32.partialorder %v4153_v56, 0.0  ;;  %3446 = vpow2.f32 %v609_v8  ;;  %v4294_v43 = vld [vmem:[%s3960_s8 + $0x1c] sm:$0xf]  ;;  %s3703_s9 = smov [#allocation11]  }
  0xaa   : > { %v617_v12 = vsel %vm537_vm2, %v4119_v42, %v3425_v31  ;;  %v632_v37 = vmul.f32 %v4028_v15, %v616_v3  ;;  %v406_v49 = vmul.f32 1.442695, %v389_v44  ;;  %vm549_vm14 = vcmp.gt.f32.partialorder %v4164_v1, 0.0  ;;  %v3431_v38 = vpop.eup %3430  ;;  %v4824_v31 = vld [vmem:[#allocation21_spill] sm:$0xff]  ;;  %p3602_p11 = pnand %p3601_p3, %p4858_p13  ;;  %s3604_s23 = sshll.u32 %s3703_s9, 4  ;;  %s3605_s23 = int_to_ptr.vmem [resolvable:$false] %s3604_s23 }
  0xab   : > { %3448 = vpow2.f32 %v611_v62  ;;  %v618_v13 = vsel %vm538_vm3, %v4127_v46, %v3427_v11  ;;  %v633_v14 = vmul.f32 %v4032_v16, %v617_v12  ;;  %v408_v41 = vmul.f32 1.442695, %v390_v59  ;;  %v3433_v62 = vpop.eup %3432  ;;  %v4825_v12 = vld [vmem:[#allocation27_spill] sm:$0xff]  ;;  %v4832_v1 = vld [vmem:[#allocation25_spill] sm:$0xff]  ;;  %s3606_s17 = scalar_lea.vmem %s3605_s23, 512  ;;  %p3607_p1 = scmp.lt.s32.totalorder %s4714_s19, %s3605_s23 }
  0xac   : > { %vm550_vm15 = vcmp.gt.f32.partialorder %v4172_v6, 0.0  ;;  %3450 = vpow2.f32 %v613_v34  ;;  %v619_v15 = vsel %vm539_vm4, %v4130_v47, %v3429_v9  ;;  %v634_v17 = vmul.f32 %v4042_v19, %v618_v13  ;;  %v3435_v8 = vpop.eup %3434  ;;  %v4272_v9 = vld [vmem:[%s3960_s8 + $0x18] sm:$0xf]  ;;  %p3603_p12 = pneg %p3602_p11  ;;  %p3608_p4 = scmp.lt.s32.totalorder %s3606_s17, %s3600_s15 }
  0xad   : > { %v410_v42 = vmul.f32 1.442695, %v391_v55  ;;  %v620_v18 = vsel %vm540_vm5, %v4133_v48, %v3431_v38  ;;  %v635_v16 = vmul.f32 %v4046_v20, %v619_v15  ;;  %v799_v46 = vcombine.low %v631_v60, %v633_v14  ;;  %v3437_v19 = vpop.eup %3436  ;;  %v4829_v15 = vld [vmem:[#allocation23_spill] sm:$0xff] }
  0xae   : > { %3452 = vpow2.f32 %v404_v4  ;;  %v621_v34 = vsel %vm541_vm6, %v4143_v52, %v3433_v62  ;;  %v636_v23 = vmul.f32 %v4050_v21, %v620_v18  ;;  %v807_v47 = vcombine.low %v632_v37, %v634_v17  ;;  %v3439_v33 = vpop.eup %3438  ;;  %v4830_v18 = vld [vmem:[#allocation29_spill] sm:$0xff]  ;;  %p3609_p9 = por %p3608_p4, %p3607_p1 }
  0xaf   : > { %vm356_vm0 = vcmp.gt.f32.partialorder %v4189_v63, 0.0  ;;  %3454 = vpow2.f32 %v406_v49  ;;  %v622_v20 = vsel %vm542_vm7, %v4146_v53, %v3435_v8  ;;  %v637_v28 = vmul.f32 %v4054_v22, %v621_v34  ;;  %v4827_v49 = vld [vmem:[#allocation20_spill] sm:$0xff] }
  0xb0   : > { %v4280_v48 = vrot.slane %v799_v46, %v4011_v10  ;;  %3456 = vpow2.f32 %v408_v41  ;;  %v623_v21 = vsel %vm543_vm8, %v4149_v54, %v3437_v19  ;;  %v638_v52 = vmul.f32 %v4061_v24, %v622_v20  ;;  %v3441_v4 = vpop.eup %3440  ;;  %p3610_p2 = pnand %p3609_p9, %p3603_p12 }
  0xb1   : > { %v4287_v60 = vrot.slane %v807_v47, %v4011_v10  ;;  %3458 = vpow2.f32 %v410_v42  ;;  %v624_v22 = vsel %vm544_vm9, %v4156_v57, %v3439_v33  ;;  %v639_v35 = vmul.f32 %v4065_v25, %v623_v21  ;;  %v3443_v36 = vpop.eup %3442 }
  0xb2   : > { %v815_v53 = vcombine.low %v635_v16, %v637_v28  ;;  %vm357_vm1 = vcmp.gt.f32.partialorder %v4192_v7, 0.0  ;;  %vm358_vm2 = vcmp.gt.f32.partialorder %v4202_v32, 0.0  ;;  %v394_v24 = vmin.f32 %v4272_v9, 0.0  ;;  %v3445_v57 = vpop.eup %3444  ;;  %v4831_v16 = vld [vmem:[#allocation24_spill] sm:$0xff] }
  0xb3   : > { %v625_v54 = vsel %vm545_vm10, %v4160_v61, %v3441_v4  ;;  %v823_v44 = vcombine.low %v636_v23, %v638_v52  ;;  %v831_v40 = vcombine.low %v4280_v48, %v4287_v60  ;;  %vm359_vm3 = vcmp.gt.f32.partialorder %v4205_v5, 0.0  ;;  %v3447_v45 = vpop.eup %3446  ;;  %v4823_v61 = vld [vmem:[#allocation26_spill] sm:$0xff] }
  0xb4   : > { %v412_v25 = vmul.f32 1.442695, %v392_v39  ;;  %v626_v3 = vsel %vm546_vm11, %v4168_v2, %v3443_v36  ;;  %v640_v59 = vmul.f32 %v4069_v26, %v624_v22  ;;  %v641_v55 = vmul.f32 %v4073_v27, %v625_v54  ;;  %v4826_v27 = vld [vmem:[#allocation22_spill] sm:$0xff] }
  0xb5   : > { %v4311_v58 = vrot.slane %v815_v53, %v4011_v10  ;;  %v627_v0 = vsel %vm547_vm12, %v4823_v61, %v3445_v57  ;;  %v642_v11 = vmul.f32 %v4824_v31, %v626_v3  ;;  %v4318_v39 = vrot.slane %v823_v44, %v4011_v10  ;;  %v3449_v2 = vpop.eup %3448  ;;  %v4834_v22 = vld [vmem:[#allocation30_spill] sm:$0xff]  ;;  %v4835_v57 = vld [vmem:[#allocation31_spill] sm:$0xff]  ;;  %v4836_v3 = vld [vmem:[#allocation32_spill] sm:$0xff] }
  0xb6   : > { %v395_v50 = vmin.f32 %v4294_v43, 0.0  ;;  %v628_v26 = vsel %vm548_vm13, %v4825_v12, %v3447_v45  ;;  %v643_v37 = vmul.f32 %v4826_v27, %v627_v0  ;;  %v839_v13 = vrot.slane %v831_v40, %v4827_v49  ;;  %v3451_v41 = vpop.eup %3450 }
  0xb7   : > { %v867_v14 = vcombine.low %v639_v35, %v641_v55  ;;  %v629_v38 = vsel %vm549_vm14, %v4828_v51, %v3449_v2  ;;  %v644_v17 = vmul.f32 %v4829_v15, %v628_v26  ;;  %v847_v42 = vcombine.low %v4311_v58, %v4318_v39  ;;  %v4837_v55 = vld [vmem:[#allocation33_spill] sm:$0xff]  ;;  %v4394_v51 = vld [vmem:[%s3960_s8 + $0x24] sm:$0xf] }
  0xb8   : > { %3460 = vpow2.f32 %v412_v25  ;;  %v3453_v62 = vpop.eup %3452  ;;  %v630_v56 = vsel %vm550_vm15, %v4830_v18, %v3451_v41  ;;  %v645_v46 = vmul.f32 %v4831_v16, %v629_v38  ;;  %v875_v34 = vcombine.low %v640_v59, %v642_v11  ;;  %v4391_v41 = vld [vmem:[%s3960_s8 + $0x20] sm:$0xf]  ;;  %v4408_v18 = vld [vmem:[%s3960_s8 + $0x2c] sm:$0xf] }
  0xb9   : > { %v4337_v8 = vrot.slane %v867_v14, %v4011_v10  ;;  %v3455_v23 = vpop.eup %3454  ;;  %v646_v47 = vmul.f32 %v4832_v1, %v630_v56  ;;  %v855_v19 = vrot.slane %v847_v42, %v4827_v49  ;;  %v4833_v20 = vmin.f32 %v4217_v29, 0.0  ;;  %v4411_v56 = vld [vmem:[%s3960_s8 + $0x30] sm:$0xf]  ;;  %v4426_v1 = vld [vmem:[%s3960_s8 + $0x3c] sm:$0xf] }
  0xba   : > { %v416_v33 = vmul.f32 1.442695, %v394_v24  ;;  %v3457_v21 = vpop.eup %3456  ;;  %v4344_v52 = vrot.slane %v875_v34, %v4011_v10  ;;  %v883_v6 = vcombine.low %v643_v37, %v645_v46  ;;  %v418_v4 = vmul.f32 1.442695, %v395_v50 }
  0xbb   : > { %v414_v28 = vmul.f32 1.442695, %v4833_v20  ;;  %v436_v35 = vsel %vm356_vm0, %v4834_v22, %v3453_v62  ;;  %v3459_v53 = vpop.eup %3458  ;;  %v863_v36 = vcombine.low %v839_v13, %v855_v19  ;;  %v891_v54 = vcombine.low %v644_v17, %v646_v47  ;;  %v4405_v62 = vld [vmem:[%s3960_s8 + $0x28] sm:$0xf] }
  0xbc   : > { %v864_v44 = vcombine.high %v839_v13, %v855_v19  ;;  %v4350_v40 = vrot.slane %v883_v6, %v4011_v10  ;;  %v899_v24 = vcombine.low %v4337_v8, %v4344_v52  ;;  %v437_v63 = vsel %vm357_vm1, %v4835_v57, %v3455_v23 }
  0xbd   : > { %3462 = vpow2.f32 %v414_v28  ;;  %v4355_v25 = vrot.slane %v891_v54, %v4011_v10  ;;  %v438_v59 = vsel %vm358_vm2, %v4836_v3, %v3457_v21  ;;  %2096 = vxpose.xlu0.b32.start [1/2] (short) (narrow) %v863_v36, 32  ;;  %v439_v45 = vsel %vm359_vm3, %v4837_v55, %v3459_v53 }
  0xbe   : > { %3464 = vpow2.f32 %v416_v33  ;;  %2225 = vxpose.xlu1.b32.start [1/2] (short) (narrow) %v864_v44, 32  ;;  %v663_v61 = vcombine.low %v436_v35, %v438_v59  ;;  %v907_v0 = vrot.slane %v899_v24, %v4827_v49  ;;  %v671_v11 = vcombine.low %v437_v63, %v439_v45 }
  0xbf   : > { %3466 = vpow2.f32 %v418_v4  ;;  %v915_v31 = vcombine.low %v4350_v40, %v4355_v25  ;;  %vm1071_vm4 = vcmask 261120   ;;  %vm360_vm5 = vcmp.gt.f32.partialorder %v4212_v30, 0.0 }
  0xc0   : > { %vm361_vm6 = vcmp.gt.f32.partialorder %v4217_v29, 0.0  ;;  %vm362_vm7 = vcmp.gt.f32.partialorder %v4272_v9, 0.0  ;;  %v376_v5 = vadd.f32 1.0, %v4212_v30  ;;  %vm363_vm8 = vcmp.gt.f32.partialorder %v4294_v43, 0.0  ;;  %vm4384_vm9 = vmpackc.low %vm1071_vm4, %vm1071_vm4 }
  0xc1   : > { %v923_v32 = vrot.slane %v915_v31, %v4827_v49  ;;  %v377_v50 = vadd.f32 1.0, %v4217_v29  ;;  %v4377_v2 = vrot.slane %v663_v61, %v4011_v10  ;;  %v4380_v12 = vrot.slane %v671_v11, %v4011_v10 }
  0xc2   : > { %v3461_v7 = vpop.eup %3460  ;;  %v378_v13 = vadd.f32 1.0, %v4272_v9  ;;  %v379_v14 = vadd.f32 1.0, %v4294_v43  ;;  %v832_v38 = vcombine.high %v4280_v48, %v4287_v60  ;;  %v848_v15 = vcombine.high %v4311_v58, %v4318_v39  ;;  %v4416_v60 = vld [vmem:[%s3960_s8 + $0x34] sm:$0xf]  ;;  %v4419_v58 = vld [vmem:[%s3960_s8 + $0x38] sm:$0xf] }
  0xc3   : > { %v931_v26 = vcombine.low %v907_v0, %v923_v32  ;;  %v932_v37 = vcombine.high %v907_v0, %v923_v32  ;;  %v900_v17 = vcombine.high %v4337_v8, %v4344_v52  ;;  %v916_v42 = vcombine.high %v4350_v40, %v4355_v25 }
  0xc4   : > { %v440_v48 = vsel %vm360_vm5, %v376_v5, %v3461_v7  ;;  %v695_v23 = vcombine.low %v4377_v2, %v4380_v12  ;;  %v396_v47 = vmin.f32 %v4391_v41, 0.0  ;;  %v397_v30 = vmin.f32 %v4394_v51, 0.0 }
  0xc5   : > { %v3230_v46 = vpack.c.bf16 %v931_v26, %v863_v36  ;;  %v3236_v34 = vpack.c.bf16 %v932_v37, %v864_v44  ;;  %2226 = vxpose.xlu1.b32.end [2/2] (short) (narrow) %v932_v37, 32  ;;  %2097 = vxpose.xlu0.b32.end [2/2] (short) (narrow) %v931_v26, 32  ;;  %v398_v20 = vmin.f32 %v4405_v62, 0.0  ;;  %v399_v28 = vmin.f32 %v4408_v18, 0.0 }
  0xc6   : > { %v400_v33 = vmin.f32 %v4411_v56, 0.0  ;;  %v401_v6 = vmin.f32 %v4416_v60, 0.0  ;;  %v402_v9 = vmin.f32 %v4419_v58, 0.0  ;;  %v403_v22 = vmin.f32 %v4426_v1, 0.0 }
  0xc7   : > { %v3463_v16 = vpop.eup %3462  ;;  %3232 = vmatprep.subr.msk.bf16.mxu0 %vm4384_vm9, %v3230_v46  ;;  %3238 = vmatprep.subr.msk.bf16.mxu1 %vm4384_vm9, %v3236_v34  ;;  %v420_v35 = vmul.f32 1.442695, %v396_v47  ;;  %v422_v53 = vmul.f32 1.442695, %v397_v30  ;;  %v703_v54 = vrot.slane %v695_v23, %v4827_v49  ;;  %v424_v44 = vmul.f32 1.442695, %v398_v20 }
  0xc8   : > { %v3465_v39 = vpop.eup %3464  ;;  %v441_v8 = vsel %vm361_vm6, %v377_v50, %v3463_v16  ;;  %3235 = vmatpush3.bf16.xpose.msk.msra.mxu0 %vm4384_vm9, %v3230_v46  ;;  %3241 = vmatpush3.bf16.xpose.msk.msra.mxu1 %vm4384_vm9, %v3236_v34  ;;  %v426_v40 = vmul.f32 1.442695, %v399_v28  ;;  %v428_v24 = vmul.f32 1.442695, %v400_v33  ;;  %v430_v25 = vmul.f32 1.442695, %v401_v6 }
  0xc9   : > { %v3467_v19 = vpop.eup %3466  ;;  %v442_v29 = vsel %vm362_vm7, %v378_v13, %v3465_v39  ;;  %3468 = vpow2.f32 %v420_v35  ;;  %v432_v57 = vmul.f32 1.442695, %v402_v9  ;;  %v846_v63 = vrot.slane %v832_v38, %v4827_v49 }
  0xca   : > { %v443_v21 = vsel %vm363_vm8, %v379_v14, %v3467_v19  ;;  %v679_v52 = vcombine.low %v440_v48, %v442_v29  ;;  %3470 = vpow2.f32 %v422_v53  ;;  %v862_v3 = vrot.slane %v848_v15, %v4827_v49 }
  0xcb   : > { %v687_v4 = vcombine.low %v441_v8, %v443_v21  ;;  %3472 = vpow2.f32 %v424_v44  ;;  %v434_v55 = vmul.f32 1.442695, %v403_v22  ;;  %v914_v45 = vrot.slane %v900_v17, %v4827_v49 }
  0xcc   : > { %v4449_v36 = vrot.slane %v679_v52, %v4011_v10  ;;  %3474 = vpow2.f32 %v426_v40  ;;  %v865_v61 = vcombine.low %v846_v63, %v862_v3  ;;  %v930_v0 = vrot.slane %v916_v42, %v4827_v49 }
  0xcd   : > { %v4453_v43 = vrot.slane %v687_v4, %v4011_v10  ;;  %v866_v31 = vcombine.high %v846_v63, %v862_v3  ;;  %3476 = vpow2.f32 %v428_v24  ;;  %v380_v26 = vadd.f32 1.0, %v4391_v41  ;;  %v4509_v24 = vld [vmem:[#allocation2] sm:$0xff] }
  0xce   : > { %3478 = vpow2.f32 %v430_v25  ;;  %v933_v7 = vcombine.low %v914_v45, %v930_v0  ;;  %v934_v32 = vcombine.high %v914_v45, %v930_v0  ;;  %2354 = vxpose.xlu0.b32.start [1/2] (short) (narrow) %v865_v61, 32  ;;  %vm364_vm10 = vcmp.gt.f32.partialorder %v4391_v41, 0.0 }
  0xcf   : > { %v711_v59 = vcombine.low %v4449_v36, %v4453_v43  ;;  %2483 = vxpose.xlu1.b32.start [1/2] (short) (narrow) %v866_v31, 32  ;;  %3480 = vpow2.f32 %v432_v57  ;;  %v381_v14 = vadd.f32 1.0, %v4394_v51  ;;  %vm365_vm11 = vcmp.gt.f32.partialorder %v4394_v51, 0.0  ;;  %v4516_v57 = vld [vmem:[#allocation2 + $0x28] sm:$0xff] }
  0xd0   : > { %3482 = vpow2.f32 %v434_v55  ;;  %v4467_v37 = vpack.c.bf16 %v933_v7, %v865_v61  ;;  %v4469_v13 = vpack.c.bf16 %v934_v32, %v866_v31  ;;  %v382_v38 = vadd.f32 1.0, %v4405_v62 }
  0xd1   : > { %v719_v11 = vrot.slane %v711_v59, %v4827_v49  ;;  %vm366_vm12 = vcmp.gt.f32.partialorder %v4405_v62, 0.0  ;;  %v383_v17 = vadd.f32 1.0, %v4408_v18  ;;  %vm367_vm13 = vcmp.gt.f32.partialorder %v4408_v18, 0.0 }
  0xd2   : > { %3244 = vmatprep.subr.msk.bf16.mxu0 %vm4384_vm9, %v4467_v37  ;;  %3250 = vmatprep.subr.msk.bf16.mxu1 %vm4384_vm9, %v4469_v13  ;;  %v384_v42 = vadd.f32 1.0, %v4411_v56  ;;  %vm368_vm14 = vcmp.gt.f32.partialorder %v4411_v56, 0.0  ;;  %v385_v34 = vadd.f32 1.0, %v4416_v60  ;;  %vm369_vm15 = vcmp.gt.f32.partialorder %v4416_v60, 0.0 }
  0xd3   : > { %v4462_v5 = vcombine.low %v703_v54, %v719_v11  ;;  %v4464_v50 = vcombine.high %v703_v54, %v719_v11  ;;  %v3469_v15 = vpop.eup %3468  ;;  %2484 = vxpose.xlu1.b32.end [2/2] (short) (narrow) %v934_v32, 32  ;;  %2355 = vxpose.xlu0.b32.end [2/2] (short) (narrow) %v933_v7, 32  ;;  %v386_v62 = vadd.f32 1.0, %v4419_v58  ;;  %vm370_vm0 = vcmp.gt.f32.partialorder %v4419_v58, 0.0  ;;  %v4534_v11 = vld [vmem:[#allocation2 + $0x10] sm:$0xff]  ;;  %v4536_v7 = vld [vmem:[#allocation2 + $0x18] sm:$0xff] }
  0xd4   : > { %v3471_v41 = vpop.eup %3470  ;;  %v444_v16 = vsel %vm364_vm10, %v380_v26, %v3469_v15  ;;  %v387_v18 = vadd.f32 1.0, %v4426_v1  ;;  %vm371_vm1 = vcmp.gt.f32.partialorder %v4426_v1, 0.0  ;;  %v696_v58 = vcombine.high %v4377_v2, %v4380_v12  ;;  %v4538_v32 = vld [vmem:[#allocation2 + $0x30] sm:$0xff]  ;;  %v4540_v26 = vld [vmem:[#allocation2 + $0x38] sm:$0xff]  ;;  %v4548_v15 = vld [vmem:[#allocation2 + $0x48] sm:$0xff] }
  0xd5   : > { %3094 = vmatprep.mubr.msk.f32.mxu0 %vm1071_vm4, %v4462_v5  ;;  %3101 = vmatprep.mubr.msk.f32.mxu1 %vm1071_vm4, %v4464_v50  ;;  %v3473_v46 = vpop.eup %3472  ;;  %v445_v48 = vsel %vm365_vm11, %v381_v14, %v3471_v41  ;;  %v712_v9 = vcombine.high %v4449_v36, %v4453_v43  ;;  %v4512_v36 = vld [vmem:[#allocation2 + $0x8] sm:$0xff]  ;;  %v4514_v43 = vld [vmem:[#allocation2 + $0x20] sm:$0xff]  ;;  %v3258_v27 = vpack.c.bf16 %v4536_v7, %v4534_v11  ;;  %vm1763_vm5 = vcmask 130048  }
  0xd6   : > { %v3475_v39 = vpop.eup %3474  ;;  %v446_v8 = vsel %vm366_vm12, %v382_v38, %v3473_v46  ;;  %v710_v44 = vrot.slane %v696_v58, %v4827_v49  ;;  %v3254_v45 = vpack.c.bf16 %v4512_v36, %v4509_v24  ;;  %v3262_v61 = vpack.c.bf16 %v4516_v57, %v4514_v43  ;;  %v4546_v38 = vld [vmem:[#allocation2 + $0x40] sm:$0xff]  ;;  %v4552_v41 = vld [vmem:[#allocation2 + $0x68] sm:$0xff]  ;;  %v4560_v46 = vld [vmem:[#allocation2 + $0x50] sm:$0xff] }
  0xd7   : > { %v3477_v23 = vpop.eup %3476  ;;  %v447_v47 = vsel %vm367_vm13, %v383_v17, %v3475_v39  ;;  %v731_v30 = vcombine.low %v444_v16, %v446_v8  ;;  %v726_v40 = vrot.slane %v712_v9, %v4827_v49  ;;  %v4550_v17 = vld [vmem:[#allocation2 + $0x60] sm:$0xff]  ;;  %v4570_v39 = vld [vmem:[#allocation2 + $0x78] sm:$0xff]  ;;  %vm4842_vm6 = vcmask 269312  }
  0xd8   : > { %v3479_v19 = vpop.eup %3478  ;;  %v448_v56 = vsel %vm368_vm14, %v384_v42, %v3477_v23  ;;  %v739_v29 = vcombine.low %v445_v48, %v447_v47  ;;  %v3270_v42 = vpack.c.bf16 %v4548_v15, %v4546_v38  ;;  %v3278_v16 = vpack.c.bf16 %v4552_v41, %v4550_v17  ;;  %v4568_v48 = vld [vmem:[#allocation2 + $0x70] sm:$0xff]  ;;  %v3413_v8 = vld [vmem:[%s282_s10 + $0x4] ss:$8 sps:$4 sm:$0xff]   ;;  %v3416_v47 = vld [vmem:[%s282_s10 + $0x20] ss:$8 sps:$4 sm:$0xff]  }
  0xd9   : > { %v3481_v51 = vpop.eup %3480  ;;  %v449_v20 = vsel %vm369_vm15, %v385_v34, %v3479_v19  ;;  %v738_v28 = vrot.slane %v731_v30, %v4011_v10  ;;  %v729_v59 = vcombine.low %v710_v44, %v726_v40  ;;  %v730_v55 = vcombine.high %v710_v44, %v726_v40  ;;  %v4566_v34 = vld [vmem:[#allocation2 + $0x58] sm:$0xff]  ;;  %vm4843_vm7 = vmmov %vm4842_vm6 }
  0xda   : > { %v3483_v60 = vpop.eup %3482  ;;  %v450_v33 = vsel %vm370_vm0, %v386_v62, %v3481_v51  ;;  %v746_v21 = vrot.slane %v739_v29, %v4011_v10  ;;  %v3274_v62 = vpack.c.bf16 %v4566_v34, %v4560_v46  ;;  %v3414_v23 = vld [vmem:[%s282_s10 + $0x10] ss:$8 sps:$4 sm:$0xff]   ;;  %v950_v19 = vrot.slane %v3413_v8, %v4011_v10  ;;  %v3419_v51 = vld [vmem:[%s282_s10 + $0x34] ss:$8 sps:$4 sm:$0xff]   ;;  %vm4844_vm8 = vmmov %vm4842_vm6 }
  0xdb   : > { %v451_v52 = vsel %vm371_vm1, %v387_v18, %v3483_v60  ;;  %v747_v6 = vcombine.low %v448_v56, %v450_v33  ;;  %v3415_v18 = vld [vmem:[%s282_s10 + $0x14] ss:$8 sps:$4 sm:$0xff]   ;;  %v3417_v56 = vld [vmem:[%s282_s10 + $0x24] ss:$8 sps:$4 sm:$0xff]   ;;  %v3418_v29 = vld [vmem:[%s282_s10 + $0x30] ss:$8 sps:$4 sm:$0xff]   ;;  %v1010_v60 = vrot.slane %v3416_v47, %v4011_v10 }
  0xdc   : > { %v755_v4 = vcombine.low %v449_v20, %v451_v52  ;;  %v763_v1 = vcombine.low %v738_v28, %v746_v21  ;;  %v764_v25 = vcombine.high %v738_v28, %v746_v21  ;;  %v958_v20 = vrot.slane %v3414_v23, %v4011_v10  ;;  %vm4846_vm10 = vmmov %vm4842_vm6 }
  0xdd   : > { %v754_v22 = vrot.slane %v747_v6, %v4011_v10  ;;  %v966_v28 = vrot.slane %v3415_v18, %v4011_v10  ;;  %v1018_v21 = vrot.slane %v3417_v56, %v4011_v10  ;;  %v1026_v52 = vrot.slane %v3418_v29, %v4011_v10  ;;  %vm4847_vm11 = vmmov %vm4842_vm6 }
  0xde   : > { %v762_v35 = vrot.slane %v755_v4, %v4011_v10  ;;  %v771_v53 = vrot.slane %v763_v1, %v4827_v49  ;;  %v778_v0 = vrot.slane %v764_v25, %v4827_v49  ;;  %v1034_v6 = vrot.slane %v3419_v51, %v4011_v10  ;;  %vm4848_vm12 = vmmov %vm4842_vm6 }
  0xdf   : > { %v983_v58 = vcombine.low %v958_v20, %v966_v28  ;;  %v1035_v4 = vcombine.low %v1010_v60, %v1018_v21  ;;  %v984_v44 = vcombine.high %v958_v20, %v966_v28  ;;  %v1036_v40 = vcombine.high %v1010_v60, %v1018_v21  ;;  %vm4849_vm13 = vmmov %vm4842_vm6 }
  0xe0   : > { %v779_v54 = vcombine.low %v754_v22, %v762_v35  ;;  %v780_v2 = vcombine.high %v754_v22, %v762_v35  ;;  %v1051_v1 = vcombine.low %v1026_v52, %v1034_v6  ;;  %vm4850_vm14 = vmmov %vm4842_vm6 }
  0xe1   : > { %v991_v22 = vrot.slane %v983_v58, %v4827_v49  ;;  %vm4851_vm15 = vmmov %vm4842_vm6 }
  0xe2   : > { %v787_v12 = vrot.slane %v779_v54, %v4827_v49  ;;  %v794_v31 = vrot.slane %v780_v2, %v4827_v49  ;;  %v1059_v54 = vrot.slane %v1051_v1, %v4827_v49  ;;  %vm4852_vm0 = vmmov %vm4842_vm6 }
  0xe3   : > { %vm4853_vm1 = vmmov %vm4852_vm0 }
  0xe4   : > { %v795_v63 = vcombine.low %v771_v53, %v787_v12  ;;  %v796_v3 = vcombine.high %v771_v53, %v787_v12  ;;  %v797_v14 = vcombine.low %v778_v0, %v794_v31  ;;  %v1043_v53 = vrot.slane %v1035_v4, %v4827_v49 }
  0xe6   : > { %3095 = vmatmul.mubr.msk.f32.vlgmr.msra.gmra.mrb[0].mxu0 %vm1071_vm4, %v795_v63  ;;  %3102 = vmatmul.mubr.msk.f32.vlgmr.msra.gmra.mrb[0].mxu1 %vm1071_vm4, %v796_v3  ;;  %v1067_v12 = vcombine.low %v1043_v53, %v1059_v54 }
  0xe7   : > { %3247 = vmatpush3.bf16.xpose.msk.msra.mxu0 %vm4384_vm9, %v4467_v37  ;;  %3253 = vmatpush3.bf16.xpose.msk.msra.mxu1 %vm4384_vm9, %v4469_v13  ;;  %v798_v37 = vcombine.high %v778_v0, %v794_v31  ;;  %v3266_v13 = vpack.c.bf16 %v4540_v26, %v4538_v32  ;;  %v1050_v0 = vrot.slane %v1036_v40, %v4827_v49  ;;  %vm4845_vm9 = vmmov %vm4842_vm6 }
  0xe8   : > { %3108 = vmatprep.mubr.msk.f32.mxu0 %vm1071_vm4, %v729_v59  ;;  %3115 = vmatprep.mubr.msk.f32.mxu1 %vm1071_vm4, %v730_v55  ;;  %v1052_v31 = vcombine.high %v1026_v52, %v1034_v6 }
  0xe9   : > { %3255 = vmatprep.subr.bf16.mxu0 %v3254_v45  ;;  %3263 = vmatprep.subr.bf16.mxu1 %v3262_v61 }
  0xee   : > { %3109 = vmatmul.mubr.msk.f32.vlgmr.msra.gmra.mrb[2].mxu0 %vm1071_vm4, %v797_v14  ;;  %3116 = vmatmul.mubr.msk.f32.vlgmr.msra.gmra.mrb[2].mxu1 %vm1071_vm4, %v798_v37 }
  0xef   : > { %3257 = vmatpush3.bf16.msra.mxu0 %v3254_v45  ;;  %3265 = vmatpush3.bf16.msra.mxu1 %v3262_v61  ;;  %v1456_v45 = vsel %vm1071_vm4, %v1067_v12, 1.0 }
  0xf0   : > { %3259 = vmatprep.subr.bf16.mxu0 %v3258_v27  ;;  %3267 = vmatprep.subr.bf16.mxu1 %v3266_v13 }
  0xf1   : > { %3126 = vmatprep.mubr.msk.f32.mxu0 %vm1071_vm4, %v4462_v5  ;;  %3137 = vmatprep.mubr.msk.f32.mxu1 %vm1071_vm4, %v4464_v50  ;;  %v3282_v5 = vpack.c.bf16 %v4570_v39, %v4568_v48  ;;  %v3412_v50 = vld [vmem:[%s282_s10] ss:$8 sps:$4 sm:$0xff]  }
  0xf2   : > { %v942_v30 = vrot.slane %v3412_v50, %v4011_v10 }
  0xf3   : > { %3261 = vmatpush3.bf16.msra.mxu0 %v3258_v27  ;;  %3269 = vmatpush3.bf16.msra.mxu1 %v3266_v13 }
  0xf4   : > { %3271 = vmatprep.subr.bf16.mxu0 %v3270_v42  ;;  %3279 = vmatprep.subr.bf16.mxu1 %v3278_v16  ;;  %v967_v33 = vcombine.low %v942_v30, %v950_v19  ;;  %v968_v35 = vcombine.high %v942_v30, %v950_v19  ;;  %v4840_v30 = vld [vmem:[#allocation19_spill] sm:$0xff]  ;;  %v4841_v19 = vlaneseq }
  0xf6   : > { %3127 = vmatmul.mubr.msk.f32.vlgmr.msra.gmra.mrb[4].mxu0 %vm1071_vm4, %v795_v63  ;;  %3138 = vmatmul.mubr.msk.f32.vlgmr.msra.gmra.mrb[4].mxu1 %vm1071_vm4, %v796_v3  ;;  %v975_v9 = vrot.slane %v967_v33, %v4827_v49  ;;  %v1068_v63 = vcombine.high %v1043_v53, %v1059_v54  ;;  %v982_v10 = vrot.slane %v968_v35, %v4827_v49  ;;  %v1424_v56 = vand.u32 127, %v4841_v19 }
  0xf7   : > { %3273 = vmatpush3.bf16.msra.mxu0 %v3270_v42  ;;  %3281 = vmatpush3.bf16.msra.mxu1 %v3278_v16  ;;  %v1066_v42 = vrot.slane %v1052_v31, %v4827_v49  ;;  %v3699_v54 = vmov 32  }
  0xf8   : > { %3275 = vmatprep.subr.bf16.mxu0 %v3274_v62  ;;  %3283 = vmatprep.subr.bf16.mxu1 %v3282_v5  ;;  %v999_v25 = vcombine.low %v975_v9, %v991_v22  ;;  %v1000_v2 = vcombine.high %v975_v9, %v991_v22  ;;  %v1458_v61 = vsel %vm1071_vm4, %v1068_v63, 1.0  ;;  %vm1425_vm3 = vcmp.ge.s32.totalorder %v4840_v30, %v1424_v56 }
  0xf9   : > { %3148 = vmatprep.mubr.msk.f32.mxu0 %vm1071_vm4, %v729_v59  ;;  %3159 = vmatprep.mubr.msk.f32.mxu1 %vm1071_vm4, %v730_v55  ;;  %v998_v55 = vrot.slane %v984_v44, %v4827_v49  ;;  %v1069_v16 = vcombine.low %v1050_v0, %v1066_v42  ;;  %v1422_v49 = vadd.s32 8, %v4840_v30 }
  0xfa   : > { %v1455_v3 = vsel %vm1071_vm4, %v999_v25, 1.0  ;;  %v1457_v59 = vsel %vm1071_vm4, %v1000_v2, 1.0  ;;  %3410 = vset.pattern.permute.xlu1 %v3699_v54 }
  0xfb   : > { %3277 = vmatpush3.bf16.msra.mxu0 %v3274_v62  ;;  %3285 = vmatpush3.bf16.msra.mxu1 %v3282_v5  ;;  %v1001_v27 = vcombine.low %v982_v10, %v998_v55  ;;  %v1002_v13 = vcombine.high %v982_v10, %v998_v55  ;;  %v1070_v5 = vcombine.high %v1050_v0, %v1066_v42  ;;  %v1460_v8 = vsel %vm1071_vm4, %v1069_v16, 1.0 }
  0xfc   : > { %vm1426_vm2 = vcmp.ge.s32.totalorder %v1422_v49, %v1424_v56  ;;  %3411 = vset.pattern.permute.xlu0 %v3699_v54 }
  0xfd   : > { %v1459_v62 = vsel %vm1071_vm4, %v1001_v27, 1.0  ;;  %v1461_v50 = vsel %vm1071_vm4, %v1002_v13, 1.0  ;;  %v1462_v23 = vsel %vm1071_vm4, %v1070_v5, 1.0 }
  0xfe   : > { %3149 = vmatmul.mubr.msk.f32.vlgmr.msra.gmra.mrb[6].mxu0 %vm1071_vm4, %v797_v14  ;;  %3160 = vmatmul.mubr.msk.f32.vlgmr.msra.gmra.mrb[6].mxu1 %vm1071_vm4, %v798_v37  ;;  %v3286_v14 = vpack.c.bf16 %v1456_v45, %v1455_v3  ;;  %v3290_v37 = vpack.c.bf16 %v1458_v61, %v1457_v59  ;;  %v3294_v18 = vpack.c.bf16 %v1460_v8, %v1459_v62 }
  0xff   : > { %v3298_v47 = vpack.c.bf16 %v1462_v23, %v1461_v50 }
 0x100   : > { %3287 = vmatprep.subr.bf16.mxu0 %v3286_v14  ;;  %3291 = vmatprep.subr.bf16.mxu1 %v3290_v37 }
 0x101   : > { %3289 = vmatpush3.bf16.msra.mxu0 %v3286_v14  ;;  %3293 = vmatpush3.bf16.msra.mxu1 %v3290_v37 }
 0x102   : > { %3295 = vmatprep.subr.bf16.mxu0 %v3294_v18  ;;  %3299 = vmatprep.subr.bf16.mxu1 %v3298_v47 }
 0x141   : > { %v2241_v44 = vpop.trf.xlu1  ;;  %v2112_v40 = vpop.trf.xlu0 }
 0x145   : > { %v2242_v25 = vpop.trf.xlu1  ;;  %v2113_v2 = vpop.trf.xlu0 }
 0x149   : > { %v2243_v12 = vpop.trf.xlu1  ;;  %v2114_v63 = vpop.trf.xlu0 }
 0x14d   : > { %v2244_v10 = vpop.trf.xlu1  ;;  %v2115_v3 = vpop.trf.xlu0 }
 0x151   : > { %v2499_v59 = vpop.trf.xlu1  ;;  %v2370_v55 = vpop.trf.xlu0 }
 0x155   : > { %v2500_v45 = vpop.trf.xlu1  ;;  %v2371_v61 = vpop.trf.xlu0 }
 0x159   : > { %v2501_v0 = vpop.trf.xlu1  ;;  %v2372_v31 = vpop.trf.xlu0 }
 0x1b9   : > { %v3096_v29 = vpop.f32.mrb[0].mxu0  ;;  %v3103_v51 = vpop.f32.mrb[0].mxu1 }
 0x1ba   : > { %v1432_v20 = vsel %vm1426_vm2, %v3096_v29, 0.0  ;;  %v1434_v28 = vsel %vm1426_vm2, %v3103_v51, 0.0  ;;  %v1150_v60 = vpop.f32.mrb[1].mxu0  ;;  %v1237_v33 = vpop.f32.mrb[1].mxu1 }
 0x1bb   : > { %v1431_v21 = vsel %vm1425_vm3, %v1150_v60, 0.0  ;;  %v1433_v52 = vsel %vm1425_vm3, %v1237_v33, 0.0 }
 0x1bc   : > { %3166 = vmatprep.mubr.msk.f32.mxu0 %vm1763_vm5, %v1431_v21  ;;  %3173 = vmatprep.mubr.msk.f32.mxu1 %vm1763_vm5, %v1433_v52 }
 0x1bd   : > { %3167 = vmatmul.mubr.msk.f32.vlgmr.msra.gmra.mrb[4].mxu0 %vm1763_vm5, %v1432_v20  ;;  %3174 = vmatmul.mubr.msk.f32.vlgmr.msra.gmra.mrb[4].mxu1 %vm1763_vm5, %v1434_v28 }
 0x1be   : > { %3297 = vmatpush3.bf16.msra.mxu0 %v3294_v18  ;;  %3301 = vmatpush3.bf16.msra.mxu1 %v3298_v47 }
 0x1bf   : > { %3303 = vmatprep.subr.bf16.mxu0 %v3286_v14  ;;  %3307 = vmatprep.subr.bf16.mxu1 %v3290_v37 }
 0x1c1   : > { %v3110_v6 = vpop.f32.mrb[2].mxu0  ;;  %v3117_v58 = vpop.f32.mrb[2].mxu1 }
 0x1c2   : > { %v1438_v9 = vsel %vm1426_vm2, %v3117_v58, 0.0  ;;  %v1324_v4 = vpop.f32.mrb[3].mxu0  ;;  %v1411_v1 = vpop.f32.mrb[3].mxu1  ;;  %v1436_v53 = vsel %vm1426_vm2, %v3110_v6, 0.0  ;;  %vm4854_vm2 = vmmov %vm4852_vm0 }
 0x1c3   : > { %v1435_v22 = vsel %vm1425_vm3, %v1324_v4, 0.0  ;;  %v1437_v35 = vsel %vm1425_vm3, %v1411_v1, 0.0  ;;  %vm4855_vm3 = vmmov %vm4852_vm0 }
 0x1c4   : > { %3180 = vmatprep.mubr.msk.f32.mxu0 %vm1763_vm5, %v1435_v22  ;;  %3187 = vmatprep.mubr.msk.f32.mxu1 %vm1763_vm5, %v1437_v35 }
 0x1c5   : > { %3181 = vmatmul.mubr.msk.f32.vlgmr.msra.gmra.mrb[6].mxu0 %vm1763_vm5, %v1436_v53  ;;  %3188 = vmatmul.mubr.msk.f32.vlgmr.msra.gmra.mrb[6].mxu1 %vm1763_vm5, %v1438_v9 }
 0x1c6   : > { %3305 = vmatpush3.bf16.msra.mxu0 %v3286_v14  ;;  %3309 = vmatpush3.bf16.msra.mxu1 %v3290_v37  ;;  %v2502_v14 = vpop.trf.xlu1  ;;  %v2373_v37 = vpop.trf.xlu0 }
 0x1c7   : > { %3311 = vmatprep.subr.bf16.mxu0 %v3294_v18  ;;  %3315 = vmatprep.subr.bf16.mxu1 %v3298_v47 }
 0x1c8   : > { %3194 = vmatprep.mubr.msk.f32.mxu0 %vm1763_vm5, %v2112_v40  ;;  %3204 = vmatprep.mubr.msk.f32.mxu1 %vm1763_vm5, %v2241_v44 }
 0x1c9   : > { %3195 = vmatmul.mubr.msk.f32.vlgmr.msra.gmra.mrb[8].mxu0 %vm1763_vm5, %v2113_v2  ;;  %3205 = vmatmul.mubr.msk.f32.vlgmr.msra.gmra.mrb[8].mxu1 %vm1763_vm5, %v2242_v25 }
 0x1ca   : > { %3313 = vmatpush3.bf16.msra.mxu0 %v3294_v18  ;;  %3317 = vmatpush3.bf16.msra.mxu1 %v3298_v47 }
 0x1cb   : > { %3197 = vmatprep.mubr.msk.f32.mxu0 %vm1763_vm5, %v2114_v63  ;;  %3207 = vmatprep.mubr.msk.f32.mxu1 %vm1763_vm5, %v2243_v12 }
 0x1cd   : > { %3198 = vmatmul.mubr.msk.f32.gmra.mrb[10].mxu0 %vm1763_vm5, %v2115_v3  ;;  %3208 = vmatmul.mubr.msk.f32.gmra.mrb[10].mxu1 %vm1763_vm5, %v2244_v10 }
 0x1ce   : > { %3214 = vmatprep.mubr.msk.f32.mxu0 %vm1763_vm5, %v2370_v55  ;;  %3224 = vmatprep.mubr.msk.f32.mxu1 %vm1763_vm5, %v2499_v59 }
 0x1d1   : > { %3215 = vmatmul.mubr.msk.f32.vlgmr.msra.gmra.mrb[12].mxu0 %vm1763_vm5, %v2371_v61  ;;  %3225 = vmatmul.mubr.msk.f32.vlgmr.msra.gmra.mrb[12].mxu1 %vm1763_vm5, %v2500_v45 }
 0x1d2   : > { %3217 = vmatprep.mubr.msk.f32.mxu0 %vm1763_vm5, %v2372_v31  ;;  %3227 = vmatprep.mubr.msk.f32.mxu1 %vm1763_vm5, %v2501_v0 }
 0x1d5   : > { %3218 = vmatmul.mubr.msk.f32.gmra.mrb[14].mxu0 %vm1763_vm5, %v2373_v37  ;;  %3228 = vmatmul.mubr.msk.f32.gmra.mrb[14].mxu1 %vm1763_vm5, %v2502_v14  ;;  %vm4856_vm5 = vmmov %vm4852_vm0 }
 0x290   : > { %v4646_v27 = vpop.f32.mrb[4].mxu0  ;;  %v4648_v13 = vpop.f32.mrb[4].mxu1 }
 0x291   : > { %v2091_v42 = vadd.f32 1e-06, %v4648_v13  ;;  %v4651_v16 = vpop.f32.mrb[5].mxu0  ;;  %v4653_v62 = vpop.f32.mrb[5].mxu1  ;;  %v2089_v19 = vadd.f32 1e-06, %v4646_v27 }
 0x292   : > { %v2090_v5 = vadd.f32 1e-06, %v4653_v62  ;;  %v2088_v20 = vadd.f32 1e-06, %v4651_v16 }
 0x293   : > { %3484 = vrcp.f32 %v2091_v42 }
 0x294   : > { %3486 = vrcp.f32 %v2090_v5 }
 0x298   : > { %v4656_v50 = vpop.f32.mrb[6].mxu0  ;;  %v4658_v8 = vpop.f32.mrb[6].mxu1 }
 0x299   : > { %v2093_v23 = vadd.f32 1e-06, %v4656_v50  ;;  %v2095_v18 = vadd.f32 1e-06, %v4658_v8  ;;  %v4662_v47 = vpop.f32.mrb[7].mxu0  ;;  %v4664_v30 = vpop.f32.mrb[7].mxu1 }
 0x29a   : > { %v2092_v49 = vadd.f32 1e-06, %v4662_v47  ;;  %v2094_v29 = vadd.f32 1e-06, %v4664_v30 }
 0x29b   : > { %3488 = vrcp.f32 %v2093_v23 }
 0x29c   : > { %3490 = vrcp.f32 %v2095_v18  ;;  %v3196_v58 = vpop.f32.mrb[8].mxu0  ;;  %v3206_v9 = vpop.f32.mrb[8].mxu1 }
 0x29d   : > { %v3485_v56 = vpop.eup %3484  ;;  %3492 = vrcp.f32 %v2092_v49  ;;  %v2613_v4 = vadd.f32 %v3196_v58, %v4512_v36  ;;  %v2617_v1 = vadd.f32 %v3206_v9, %v4516_v57  ;;  %v2206_v22 = vpop.f32.mrb[9].mxu0 }
 0x29e   : > { %2678 = vperm.xlu1 %3410, %v3485_v56   ;;  %v3487_v51 = vpop.eup %3486  ;;  %3494 = vrcp.f32 %v2089_v19  ;;  %v2335_v35 = vpop.f32.mrb[9].mxu1  ;;  %v2612_v53 = vadd.f32 %v2206_v22, %v4509_v24 }
 0x29f   : > { %2673 = vperm.xlu0 %3411, %v3487_v51   ;;  %3496 = vrcp.f32 %v2094_v29  ;;  %v2616_v54 = vadd.f32 %v2335_v35, %v4514_v43  ;;  %2630 = vst.msk [vmem:[#allocation2 + $0x8] sm:$0xff] %vm4842_vm6, %v2613_v4  ;;  %vm4857_vm6 = vmmov %vm4852_vm0 }
 0x2a0   : > { %3498 = vrcp.f32 %v2088_v20  ;;  %2634 = vst.msk [vmem:[#allocation2 + $0x28] sm:$0xff] %vm4843_vm7, %v2617_v1  ;;  %v3199_v44 = vpop.f32.mrb[10].mxu0  ;;  %v3209_v40 = vpop.f32.mrb[10].mxu1  ;;  %vm2735_vm7 = vcmask 523264  }
 0x2a1   : > { %2629 = vst.msk [vmem:[#allocation2] sm:$0xff] %vm4844_vm8, %v2612_v53  ;;  %v2615_v36 = vadd.f32 %v3199_v44, %v4536_v7  ;;  %v2619_v57 = vadd.f32 %v3209_v40, %v4540_v26  ;;  %v2216_v25 = vpop.f32.mrb[11].mxu0  ;;  %v2345_v2 = vpop.f32.mrb[11].mxu1  ;;  %vm2738_vm8 = vcmask 785408  }
 0x2a2   : > { %2633 = vst.msk [vmem:[#allocation2 + $0x20] sm:$0xff] %vm4845_vm9, %v2616_v54  ;;  %v2614_v24 = vadd.f32 %v2216_v25, %v4534_v11  ;;  %v2618_v43 = vadd.f32 %v2345_v2, %v4538_v32 }
 0x2a3   : > { %2632 = vst.msk [vmem:[#allocation2 + $0x18] sm:$0xff] %vm4846_vm10, %v2615_v36 }
 0x2a4   : > { %2636 = vst.msk [vmem:[#allocation2 + $0x38] sm:$0xff] %vm4847_vm11, %v2619_v57  ;;  %v3216_v12 = vpop.f32.mrb[12].mxu0  ;;  %v3226_v63 = vpop.f32.mrb[12].mxu1 }
 0x2a5   : > { %v3489_v28 = vpop.eup %3488  ;;  %2631 = vst.msk [vmem:[#allocation2 + $0x10] sm:$0xff] %vm4848_vm12, %v2614_v24  ;;  %v2621_v7 = vadd.f32 %v3216_v12, %v4548_v15  ;;  %v2625_v26 = vadd.f32 %v3226_v63, %v4552_v41  ;;  %v2464_v10 = vpop.f32.mrb[13].mxu0 }
 0x2a6   : > { %v3491_v60 = vpop.eup %3490  ;;  %2688 = vperm.xlu1 %3410, %v3489_v28   ;;  %2635 = vst.msk [vmem:[#allocation2 + $0x30] sm:$0xff] %vm4849_vm13, %v2618_v43  ;;  %v2593_v3 = vpop.f32.mrb[13].mxu1  ;;  %v2620_v11 = vadd.f32 %v2464_v10, %v4546_v38 }
 0x2a7   : > { %2698 = vperm.xlu0 %3411, %v3491_v60   ;;  %v3493_v33 = vpop.eup %3492  ;;  %v2624_v32 = vadd.f32 %v2593_v3, %v4550_v17  ;;  %2638 = vst.msk [vmem:[#allocation2 + $0x48] sm:$0xff] %vm4850_vm14, %v2621_v7 }
 0x2a8   : > { %v3495_v21 = vpop.eup %3494  ;;  %2642 = vst.msk [vmem:[#allocation2 + $0x68] sm:$0xff] %vm4851_vm15, %v2625_v26  ;;  %v3219_v45 = vpop.f32.mrb[14].mxu0 }
 0x2a9   : > { %v3497_v52 = vpop.eup %3496  ;;  %2637 = vst.msk [vmem:[#allocation2 + $0x40] sm:$0xff] %vm4852_vm0, %v2620_v11  ;;  %v2623_v38 = vadd.f32 %v3219_v45, %v4566_v34  ;;  %v3229_v17 = vpop.f32.mrb[14].mxu1 }
 0x2aa   : > { %2683 = vperm.xlu1 %3410, %v3493_v33   ;;  %v3499_v6 = vpop.eup %3498  ;;  %2641 = vst.msk [vmem:[#allocation2 + $0x60] sm:$0xff] %vm4853_vm1, %v2624_v32  ;;  %v2474_v61 = vpop.f32.mrb[15].mxu0  ;;  %v2627_v0 = vadd.f32 %v3229_v17, %v4570_v39 }
 0x2ab   : > { %2668 = vperm.xlu0 %3411, %v3495_v21   ;;  %v2622_v31 = vadd.f32 %v2474_v61, %v4560_v46  ;;  %v2603_v14 = vpop.f32.mrb[15].mxu1  ;;  %2640 = vst.msk [vmem:[#allocation2 + $0x58] sm:$0xff] %vm4854_vm2, %v2623_v38 }
 0x2ac   : > { %v2626_v37 = vadd.f32 %v2603_v14, %v4568_v48  ;;  %2644 = vst.msk [vmem:[#allocation2 + $0x78] sm:$0xff] %vm4855_vm3, %v2627_v0 }
 0x2ad   : > { %2639 = vst.msk [vmem:[#allocation2 + $0x50] sm:$0xff] %vm4856_vm5, %v2622_v31 }
 0x2ae   : > { %2693 = vperm.xlu1 %3410, %v3497_v52   ;;  %2643 = vst.msk [vmem:[#allocation2 + $0x70] sm:$0xff] %vm4857_vm6, %v2626_v37 }
 0x2b2   : > { %2663 = vperm.xlu1 %3410, %v3499_v6  }
 0x31d   : > { %v2679_v59 = vpop.permute.xlu1 %2678 }
 0x31e   : > { %v2704_v55 = vmul.f32 %v4648_v13, %v2679_v59  ;;  %v2674_v15 = vpop.permute.xlu0 %2673 }
 0x31f   : > { %v2703_v41 = vmul.f32 %v2674_v15, %v4653_v62 }
 0x320   : > { %2713 = vrot.lane.b32.xlu0 %v2704_v55, %s3700_s29 }
 0x321   : > { %2711 = vrot.lane.b32.xlu1 %v2703_v41, %s3700_s29 }
 0x325   : > { %v2689_v13 = vpop.permute.xlu1 %2688 }
 0x326   : > { %v2706_v34 = vmul.f32 %v4656_v50, %v2689_v13  ;;  %v2699_v42 = vpop.permute.xlu0 %2698 }
 0x327   : > { %v2708_v39 = vmul.f32 %v4658_v8, %v2699_v42 }
 0x328   : > { %2721 = vrot.lane.b32.xlu0 %v2706_v34, %s3701_s6 }
 0x329   : > { %v2684_v46 = vpop.permute.xlu1 %2683 }
 0x32a   : > { %v2705_v62 = vmul.f32 %v2684_v46, %v4662_v47  ;;  %v2669_v23 = vpop.permute.xlu0 %2668 }
 0x32b   : > { %v2702_v56 = vmul.f32 %v4646_v27, %v2669_v23 }
 0x32c   : > { %2729 = vrot.lane.b32.xlu0 %v2708_v39, %s3702_s18  ;;  %2719 = vrot.lane.b32.xlu1 %v2705_v62, %s3701_s6 }
 0x32d   : > { %v2694_v48 = vpop.permute.xlu1 %2693 }
 0x32e   : > { %v2707_v5 = vmul.f32 %v2694_v48, %v4664_v30 }
 0x330   : > { %2727 = vrot.lane.b32.xlu1 %v2707_v5, %s3702_s18 }
 0x331   : > { %v2664_v18 = vpop.permute.xlu1 %2663 }
 0x332   : > { %v2701_v51 = vmul.f32 %v2664_v18, %v4651_v16 }
 0x392   : > { %v2714_v50 = vpop.permute.xlu0 %2713 }
 0x393   : > { %v2712_v49 = vpop.permute.xlu1 %2711  ;;  %v2734_v8 = vsel %vm1071_vm4, %v2702_v56, %v2714_v50 }
 0x394   : > { %v2733_v27 = vsel %vm1071_vm4, %v2701_v51, %v2712_v49 }
 0x39a   : > { %v2722_v19 = vpop.permute.xlu0 %2721 }
 0x39b   : > { %v2737_v47 = vsel %vm2735_vm7, %v2734_v8, %v2722_v19 }
 0x39e   : > { %v2730_v29 = vpop.permute.xlu0 %2729  ;;  %v2720_v30 = vpop.permute.xlu1 %2719 }
 0x39f   : > { %v2740_v20 = vsel %vm2738_vm8, %v2737_v47, %v2730_v29  ;;  %v2736_v28 = vsel %vm2735_vm7, %v2733_v27, %v2720_v30 }
 0x3a0   : > { %2742 = vst [vmem:[%s314_s16 + $0x8] sm:$0xff] %v2740_v20 }
 0x3a2   : > { %v2728_v60 = vpop.permute.xlu1 %2727 }
 0x3a3   : > { %v2739_v33 = vsel %vm2738_vm8, %v2736_v28, %v2728_v60 }
 0x3a4   : > { %2741 = vst [vmem:[%s314_s16] sm:$0xff] %v2739_v33 }
 0x3a5   : > { %3613 = shalt.err (!%p3610_p2)
}
 0x3a6   : > { %s3614_s8 = scalar_lea.hbm %s4720_s14, 256  ;;  %s3618_s22 = scalar_lea.hbm %s4774_s4, 512 }
 0x3a7   : > { %p3615_p0 = scmp.ne.s32.totalorder %s4720_s14, %s3614_s8  ;;  %p3619_p10 = scmp.lt.u32.totalorder %s4720_s14, %s4774_s4 }
 0x3a8   : > { %p3620_p7 = scmp.lt.u32.totalorder %s3618_s22, %s3614_s8  ;;  %p3622_p3 = scmp.lt.u32.totalorder %s3614_s8, %s4720_s14 }
 0x3a9   : > { %p3616_p5 = pnand %p3615_p0, %p4858_p13 }
 0x3aa   : > { %p3621_p6 = por %p3620_p7, %p3619_p10 }
 0x3ab   : > { %p3617_p8 = pneg %p3616_p5 }
 0x3ac   : > { %p3623_p11 = por %p3622_p3, %p3621_p6 }
 0x3ae   : > { %p3624_p12 = pnand %p3623_p11, %p3617_p8 }
 0x3b0   : > { %3627 = shalt.err (!%p3624_p12)
}
 0x3b1   : > { %s3704_s29 = smov 128   ;;  %s3705_s6 = smov 8  }
 0x3b2   : > { %3332 = dma.vmem_to_hbm [thread:$0]  (%p4858_p13), %s4714_s19, 256, %s4720_s14, %s2744_s28, %s3704_s29, %s3704_s29, %s3705_s6  }
 0x3b3 PF: > { %s2775_s18 = sand.u32 1, %s3668_s25   ;;  %p4859_p1 = scmp.ne.s32.totalorder %s4796_s13, 0 }
 0x3b4   : > { %p4860_p4 = scmp.ge.s32.totalorder %s3688_s0, 2  ;;  %s2776_s20 = scalar_lea.sflag [#allocation7], %s2775_s18 }
 0x3b6   : > { %p3345_p9 = pnand %p4860_p4, %p4859_p1 }
 0x3b8   : > { %3663 = dma.done.wait (!%p3345_p9), %s2776_s20, 256  }
 0x3b9   : > { %3665 = vsyncadd (!%p3345_p9), %s2776_s20, 4294967040  ;;  %s27_s0 = sadd.s32 1, %s3688_s0   ;;  %s4861_s16 = sld [smem:[#allocation18_spill]] }
 0x3ba   : > { %p24_p2 = scmp.ge.s32.totalorder %s27_s0, 4   ;;  %s4862_s28 = sld [smem:[#allocation16_spill]] }
 0x3bb   : > { %s4863_s29 = sld [smem:[#allocation17_spill]]  ;;  %s4864_s25 = smov %s3672_s26 }
 0x3bc   : > { %s4865_s26 = smov %s3676_s27  ;;  %26 = sbr.rel (!%p24_p2) target bundleno = 20 (0x14), region = 105 }
 0x3bf   : > { %s4866_s27 = smov %s4861_s16 }
 0x3c3   :  { %2781 = vsyncpa [#allocation6], 1 }
 0x3c4   :  { %2783 = vsyncpa [#allocation6 + $0x1], 1 }
 0x3c5   :  { %2784 = vsyncpa [#allocation9], 1 }
 0x3c6   :  { %2786 = vsyncpa [#allocation9 + $0x1], 1 }
 0x3c7   :  { %2787 = vsyncpa [#allocation7], 1 }
 0x3c8   :  { %2789 = vsyncpa [#allocation7 + $0x1], 1 }

</bundles_post_ra>
